<compile_context>
chip_gen: v6e
topology: v6e:2x2x1
jax: 0.10.0
libtpu: 0.0.40
codegen_flags: <defaults>
</compile_context>

<pallas_src>
import math

import jax
import jax.numpy as jnp
from jax.experimental import pallas as pl
from jax.experimental.pallas import tpu as pltpu

LANE = 128


def _conv_relu_kernel(x_ref, w_ref, o_ref, col_ref):
    # x_ref:   (1, 1, TH+KH-1, Wp, Cin)  haloed, spatially pre-padded NHWC input tile
    # w_ref:   (KH*KW*Cin, Cout_p)       2-D weight slab (Cout zero-padded to 128k)
    # o_ref:   (1, 1, TH, Wout, Cout_p)  output tile (lane-dense last dim)
    # col_ref: (TH*Wout, KH*KW*Cin)      VMEM im2col scratch
    _, _, TH, Wout, Cout_p = o_ref.shape
    Cin = x_ref.shape[-1]
    KH = x_ref.shape[2] - TH + 1
    KW = x_ref.shape[3] - Wout + 1
    K = w_ref.shape[0]
    assert K == KH * KW * Cin

    # Build the im2col matrix once per block (static KH*KW unrolled taps).
    for kh in range(KH):
        for kw in range(KW):
            tap = kh * KW + kw
            patch = x_ref[0, 0, kh:kh + TH, kw:kw + Wout, :]
            col_ref[:, tap * Cin:(tap + 1) * Cin] = patch.reshape(TH * Wout, Cin)

    # Single MXU contraction over K = KH*KW*Cin, f32 accumulation, fused ReLU.
    acc = jnp.dot(col_ref[...], w_ref[...], preferred_element_type=jnp.float32)
    out = jnp.maximum(acc, 0.0)
    o_ref[...] = out.reshape(o_ref.shape).astype(o_ref.dtype)


def conv_bn_relu(x_nchw, weight_oihw, *, stride=1, padding=1,
                 h_tile=None, compute_dtype=None):
    """Forward of ConvBNReLU: conv (no bias) -> ReLU (module forward has no BN)."""
    N, Cin, H, W = x_nchw.shape
    Cout, Cin_w, KH, KW = weight_oihw.shape
    assert Cin == Cin_w
    # TODO(synk): stride != 1 (BiSeNet downsampling configs) not implemented here.
    assert stride == 1

    Hout = H + 2 * padding - KH + 1
    Wout = W + 2 * padding - KW + 1
    Wp = W + 2 * padding

    cdt = x_nchw.dtype if compute_dtype is None else compute_dtype

    # Lane-dense output channels (pad Cout up to a multiple of 128).
    Cout_p = int(pl.cdiv(Cout, LANE)) * LANE

    # H tiling with a KH-1 halo per tile.
    if h_tile is None:
        h_tile = min(Hout, 64)
    h_tile = min(h_tile, Hout)
    nH = int(pl.cdiv(Hout, h_tile))
    Hh = h_tile + KH - 1

    # Weights: OIHW -> (KH, KW, Cin, Cout) -> one 2-D MXU slab, Cout zero-padded.
    w_slab = jnp.transpose(weight_oihw, (2, 3, 1, 0)).reshape(KH * KW * Cin, Cout)
    w_slab = jnp.pad(w_slab, ((0, 0), (0, Cout_p - Cout))).astype(cdt)

    # Input glue (one XLA fusion): NCHW -> NHWC, zero pad (conv padding + enough bottom
    # rows so every H tile is full), stack overlapping H tiles so each grid block is a
    # plain Blocked window (no halo index_map needed).
    # TODO(synk): a fully fused path would do the NCHW->NHWC transpose on the
    # VMEM-resident tile inside the kernel instead of as wrapper glue.
    x_nhwc = jnp.transpose(x_nchw, (0, 2, 3, 1))
    pad_bottom = padding + (nH * h_tile - Hout)
    x_pad = jnp.pad(x_nhwc, ((0, 0), (padding, pad_bottom),
                             (padding, padding), (0, 0)))
    x_tiles = jnp.stack(
        [x_pad[:, i * h_tile: i * h_tile + Hh] for i in range(nH)],
        axis=1).astype(cdt)                       # (N, nH, Hh, Wp, Cin)

    K = KH * KW * Cin

    # Scoped-VMEM budget from the actual per-block footprint (double-buffered).
    isz = jnp.dtype(cdt).itemsize
    osz = jnp.dtype(x_nchw.dtype).itemsize
    in_tile_b = Hh * Wp * Cin * isz
    out_tile_b = h_tile * Wout * Cout_p * osz
    w_bytes = K * Cout_p * isz
    col_bytes = h_tile * Wout * K * isz
    vmem_limit = int(min(max(2 * (in_tile_b + out_tile_b + w_bytes) + col_bytes
                             + (1 << 20), 16 * 1024 * 1024), 64 * 1024 * 1024))

    out_tiles = pl.pallas_call(
        _conv_relu_kernel,
        out_shape=jax.ShapeDtypeStruct((N, nH, h_tile, Wout, Cout_p), x_nchw.dtype),
        grid=(N, nH),
        in_specs=[
            pl.BlockSpec((1, 1, Hh, Wp, Cin), lambda n, h: (n, h, 0, 0, 0)),
            pl.BlockSpec((K, Cout_p), lambda n, h: (0, 0)),
        ],
        out_specs=pl.BlockSpec((1, 1, h_tile, Wout, Cout_p),
                               lambda n, h: (n, h, 0, 0, 0)),
        scratch_shapes=[pltpu.VMEM((h_tile * Wout, K), cdt)],
        compiler_params=pltpu.CompilerParams(
            dimension_semantics=("parallel", "parallel"),
            vmem_limit_bytes=vmem_limit),
    )(x_tiles, w_slab)

    out = out_tiles.reshape(N, nH * h_tile, Wout, Cout_p)[:, :Hout, :, :Cout]
    return jnp.transpose(out, (0, 3, 1, 2))       # back to NCHW


if __name__ == "__main__":
    # Small shapes consistent with the module: batch=2, in_chan=4, out_chan=8, 16x16.
    N, Cin, H, W = 2, 4, 16, 16
    Cout, KS, STRIDE, PAD = 8, 3, 1, 1

    key = jax.random.PRNGKey(0)
    kx, kw = jax.random.split(key)

    x = jax.random.normal(kx, (N, Cin, H, W), dtype=jnp.float32)

    # kaiming_normal_(weight, a=1): gain = sqrt(2/(1+a^2)) = 1, fan_in = Cin*KS*KS
    fan_in = Cin * KS * KS
    std = 1.0 / math.sqrt(fan_in)
    weight = jax.random.normal(kw, (Cout, Cin, KS, KS), dtype=jnp.float32) * std

    out = conv_bn_relu(x, weight, stride=STRIDE, padding=PAD)
    out = jax.block_until_ready(out)

    # Reference check against XLA conv (NCHW, OIHW) + ReLU.
    ref = jax.lax.conv_general_dilated(
        x, weight, window_strides=(STRIDE, STRIDE),
        padding=((PAD, PAD), (PAD, PAD)),
        dimension_numbers=("NCHW", "OIHW", "NCHW"))
    ref = jnp.maximum(ref, 0.0)
    assert out.shape == (N, Cout, H, W)
    assert jnp.allclose(out, ref, atol=1e-4, rtol=1e-5)

    print("KERNEL_OK")
</pallas_src>

<mosaic_0001>
module attributes {stable_mosaic.version = 11 : i64} {
  func.func @_conv_relu_kernel(%arg0: i32, %arg1: i32, %arg2: memref<1x1x18x18x4xf32, #tpu.memory_space<vmem>>, %arg3: memref<36x128xf32, #tpu.memory_space<vmem>>, %arg4: memref<1x1x16x16x128xf32, #tpu.memory_space<vmem>>, %arg5: memref<256x36xf32, #tpu.memory_space<vmem>>) attributes {dimension_semantics = [#tpu.dimension_semantics<parallel>, #tpu.dimension_semantics<parallel>], iteration_bounds = array<i64: 2, 1>, scalar_prefetch = 0 : i64, scratch_operands = 1 : i64, tpu.core_type = #tpu.core_type<tc>, window_params = [{transform_indices = @transform_0, window_bounds = array<i64: 1, 1, 18, 18, 4>}, {pipeline_mode = #tpu.pipeline_mode<synchronous>, transform_indices = @transform_1, window_bounds = array<i64: 36, 128>}, {transform_indices = @transform_2, window_bounds = array<i64: 1, 1, 16, 16, 128>}]} {
    %c0 = arith.constant 0 : index
    %c0_0 = arith.constant 0 : index
    %c0_1 = arith.constant 0 : index
    %c0_2 = arith.constant 0 : index
    %c0_3 = arith.constant 0 : index
    %0 = vector.load %arg2[%c0, %c0_0, %c0_1, %c0_2, %c0_3] : memref<1x1x18x18x4xf32, #tpu.memory_space<vmem>>, vector<1x1x16x16x4xf32>
    %1 = vector.shape_cast %0 : vector<1x1x16x16x4xf32> to vector<16x16x4xf32>
    %2 = vector.shape_cast %1 : vector<16x16x4xf32> to vector<256x4xf32>
    %c0_4 = arith.constant 0 : index
    %c0_5 = arith.constant 0 : index
    %3 = vector.load %arg5[%c0_4, %c0_5] : memref<256x36xf32, #tpu.memory_space<vmem>>, vector<256x4xf32>
    tpu.vector_store %arg5[%c0_4, %c0_5], %2 {strides = array<i32>} : memref<256x36xf32, #tpu.memory_space<vmem>>, vector<256x4xf32>,
    %c0_6 = arith.constant 0 : index
    %c0_7 = arith.constant 0 : index
    %c0_8 = arith.constant 0 : index
    %c1 = arith.constant 1 : index
    %c0_9 = arith.constant 0 : index
    %4 = vector.load %arg2[%c0_6, %c0_7, %c0_8, %c1, %c0_9] : memref<1x1x18x18x4xf32, #tpu.memory_space<vmem>>, vector<1x1x16x16x4xf32>
    %5 = vector.shape_cast %4 : vector<1x1x16x16x4xf32> to vector<16x16x4xf32>
    %6 = vector.shape_cast %5 : vector<16x16x4xf32> to vector<256x4xf32>
    %c0_10 = arith.constant 0 : index
    %c4 = arith.constant 4 : index
    %7 = vector.load %arg5[%c0_10, %c4] : memref<256x36xf32, #tpu.memory_space<vmem>>, vector<256x4xf32>
    tpu.vector_store %arg5[%c0_10, %c4], %6 {strides = array<i32>} : memref<256x36xf32, #tpu.memory_space<vmem>>, vector<256x4xf32>,
    %c0_11 = arith.constant 0 : index
    %c0_12 = arith.constant 0 : index
    %c0_13 = arith.constant 0 : index
    %c2 = arith.constant 2 : index
    %c0_14 = arith.constant 0 : index
    %8 = vector.load %arg2[%c0_11, %c0_12, %c0_13, %c2, %c0_14] : memref<1x1x18x18x4xf32, #tpu.memory_space<vmem>>, vector<1x1x16x16x4xf32>
    %9 = vector.shape_cast %8 : vector<1x1x16x16x4xf32> to vector<16x16x4xf32>
    %10 = vector.shape_cast %9 : vector<16x16x4xf32> to vector<256x4xf32>
    %c0_15 = arith.constant 0 : index
    %c8 = arith.constant 8 : index
    %11 = vector.load %arg5[%c0_15, %c8] : memref<256x36xf32, #tpu.memory_space<vmem>>, vector<256x4xf32>
    tpu.vector_store %arg5[%c0_15, %c8], %10 {strides = array<i32>} : memref<256x36xf32, #tpu.memory_space<vmem>>, vector<256x4xf32>,
    %c0_16 = arith.constant 0 : index
    %c0_17 = arith.constant 0 : index
    %c1_18 = arith.constant 1 : index
    %c0_19 = arith.constant 0 : index
    %c0_20 = arith.constant 0 : index
    %12 = vector.load %arg2[%c0_16, %c0_17, %c1_18, %c0_19, %c0_20] : memref<1x1x18x18x4xf32, #tpu.memory_space<vmem>>, vector<1x1x16x16x4xf32>
    %13 = vector.shape_cast %12 : vector<1x1x16x16x4xf32> to vector<16x16x4xf32>
    %14 = vector.shape_cast %13 : vector<16x16x4xf32> to vector<256x4xf32>
    %c0_21 = arith.constant 0 : index
    %c12 = arith.constant 12 : index
    %15 = vector.load %arg5[%c0_21, %c12] : memref<256x36xf32, #tpu.memory_space<vmem>>, vector<256x4xf32>
    tpu.vector_store %arg5[%c0_21, %c12], %14 {strides = array<i32>} : memref<256x36xf32, #tpu.memory_space<vmem>>, vector<256x4xf32>,
    %c0_22 = arith.constant 0 : index
    %c0_23 = arith.constant 0 : index
    %c1_24 = arith.constant 1 : index
    %c1_25 = arith.constant 1 : index
    %c0_26 = arith.constant 0 : index
    %16 = vector.load %arg2[%c0_22, %c0_23, %c1_24, %c1_25, %c0_26] : memref<1x1x18x18x4xf32, #tpu.memory_space<vmem>>, vector<1x1x16x16x4xf32>
    %17 = vector.shape_cast %16 : vector<1x1x16x16x4xf32> to vector<16x16x4xf32>
    %18 = vector.shape_cast %17 : vector<16x16x4xf32> to vector<256x4xf32>
    %c0_27 = arith.constant 0 : index
    %c16 = arith.constant 16 : index
    %19 = vector.load %arg5[%c0_27, %c16] : memref<256x36xf32, #tpu.memory_space<vmem>>, vector<256x4xf32>
    tpu.vector_store %arg5[%c0_27, %c16], %18 {strides = array<i32>} : memref<256x36xf32, #tpu.memory_space<vmem>>, vector<256x4xf32>,
    %c0_28 = arith.constant 0 : index
    %c0_29 = arith.constant 0 : index
    %c1_30 = arith.constant 1 : index
    %c2_31 = arith.constant 2 : index
    %c0_32 = arith.constant 0 : index
    %20 = vector.load %arg2[%c0_28, %c0_29, %c1_30, %c2_31, %c0_32] : memref<1x1x18x18x4xf32, #tpu.memory_space<vmem>>, vector<1x1x16x16x4xf32>
    %21 = vector.shape_cast %20 : vector<1x1x16x16x4xf32> to vector<16x16x4xf32>
    %22 = vector.shape_cast %21 : vector<16x16x4xf32> to vector<256x4xf32>
    %c0_33 = arith.constant 0 : index
    %c20 = arith.constant 20 : index
    %23 = vector.load %arg5[%c0_33, %c20] : memref<256x36xf32, #tpu.memory_space<vmem>>, vector<256x4xf32>
    tpu.vector_store %arg5[%c0_33, %c20], %22 {strides = array<i32>} : memref<256x36xf32, #tpu.memory_space<vmem>>, vector<256x4xf32>,
    %c0_34 = arith.constant 0 : index
    %c0_35 = arith.constant 0 : index
    %c2_36 = arith.constant 2 : index
    %c0_37 = arith.constant 0 : index
    %c0_38 = arith.constant 0 : index
    %24 = vector.load %arg2[%c0_34, %c0_35, %c2_36, %c0_37, %c0_38] : memref<1x1x18x18x4xf32, #tpu.memory_space<vmem>>, vector<1x1x16x16x4xf32>
    %25 = vector.shape_cast %24 : vector<1x1x16x16x4xf32> to vector<16x16x4xf32>
    %26 = vector.shape_cast %25 : vector<16x16x4xf32> to vector<256x4xf32>
    %c0_39 = arith.constant 0 : index
    %c24 = arith.constant 24 : index
    %27 = vector.load %arg5[%c0_39, %c24] : memref<256x36xf32, #tpu.memory_space<vmem>>, vector<256x4xf32>
    tpu.vector_store %arg5[%c0_39, %c24], %26 {strides = array<i32>} : memref<256x36xf32, #tpu.memory_space<vmem>>, vector<256x4xf32>,
    %c0_40 = arith.constant 0 : index
    %c0_41 = arith.constant 0 : index
    %c2_42 = arith.constant 2 : index
    %c1_43 = arith.constant 1 : index
    %c0_44 = arith.constant 0 : index
    %28 = vector.load %arg2[%c0_40, %c0_41, %c2_42, %c1_43, %c0_44] : memref<1x1x18x18x4xf32, #tpu.memory_space<vmem>>, vector<1x1x16x16x4xf32>
    %29 = vector.shape_cast %28 : vector<1x1x16x16x4xf32> to vector<16x16x4xf32>
    %30 = vector.shape_cast %29 : vector<16x16x4xf32> to vector<256x4xf32>
    %c0_45 = arith.constant 0 : index
    %c28 = arith.constant 28 : index
    %31 = vector.load %arg5[%c0_45, %c28] : memref<256x36xf32, #tpu.memory_space<vmem>>, vector<256x4xf32>
    tpu.vector_store %arg5[%c0_45, %c28], %30 {strides = array<i32>} : memref<256x36xf32, #tpu.memory_space<vmem>>, vector<256x4xf32>,
    %c0_46 = arith.constant 0 : index
    %c0_47 = arith.constant 0 : index
    %c2_48 = arith.constant 2 : index
    %c2_49 = arith.constant 2 : index
    %c0_50 = arith.constant 0 : index
    %32 = vector.load %arg2[%c0_46, %c0_47, %c2_48, %c2_49, %c0_50] : memref<1x1x18x18x4xf32, #tpu.memory_space<vmem>>, vector<1x1x16x16x4xf32>
    %33 = vector.shape_cast %32 : vector<1x1x16x16x4xf32> to vector<16x16x4xf32>
    %34 = vector.shape_cast %33 : vector<16x16x4xf32> to vector<256x4xf32>
    %c0_51 = arith.constant 0 : index
    %c32 = arith.constant 32 : index
    %35 = vector.load %arg5[%c0_51, %c32] : memref<256x36xf32, #tpu.memory_space<vmem>>, vector<256x4xf32>
    tpu.vector_store %arg5[%c0_51, %c32], %34 {strides = array<i32>} : memref<256x36xf32, #tpu.memory_space<vmem>>, vector<256x4xf32>,
    %c0_52 = arith.constant 0 : index
    %c0_53 = arith.constant 0 : index
    %36 = vector.load %arg5[%c0_52, %c0_53] : memref<256x36xf32, #tpu.memory_space<vmem>>, vector<256x36xf32>
    %c0_54 = arith.constant 0 : index
    %c0_55 = arith.constant 0 : index
    %37 = vector.load %arg3[%c0_54, %c0_55] : memref<36x128xf32, #tpu.memory_space<vmem>>, vector<36x128xf32>
    %cst = arith.constant dense<0.000000e+00> : vector<256x128xf32>
    %38 = tpu.matmul %36, %37, %cst {dimension_numbers = #tpu.dot_dimension_numbers<[1], [0], [0], [1], [0, 0, 1, 1], [], []>} : vector<256x36xf32>, vector<36x128xf32>, vector<256x128xf32> -> vector<256x128xf32>
    %cst_56 = arith.constant 0.000000e+00 : f32
    %39 = vector.broadcast %cst_56 : f32 to vector<256x128xf32>
    %40 = arith.maximumf %38, %39 : vector<256x128xf32>
    %41 = vector.shape_cast %40 : vector<256x128xf32> to vector<1x1x16x16x128xf32>
    %c0_57 = arith.constant 0 : index
    %c0_58 = arith.constant 0 : index
    %c0_59 = arith.constant 0 : index
    %c0_60 = arith.constant 0 : index
    %c0_61 = arith.constant 0 : index
    %42 = vector.load %arg4[%c0_57, %c0_58, %c0_59, %c0_60, %c0_61] : memref<1x1x16x16x128xf32, #tpu.memory_space<vmem>>, vector<1x1x16x16x128xf32>
    tpu.vector_store %arg4[%c0_57, %c0_58, %c0_59, %c0_60, %c0_61], %41 {strides = array<i32>} : memref<1x1x16x16x128xf32, #tpu.memory_space<vmem>>, vector<1x1x16x16x128xf32>,
    return
  }
  func.func @transform_0(%arg0: i32, %arg1: i32) -> (i32, i32, i32, i32, i32) {
    %c0_i32 = arith.constant 0 : i32
    %c0_i32_0 = arith.constant 0 : i32
    %c0_i32_1 = arith.constant 0 : i32
    %c0_i32_2 = arith.constant 0 : i32
    return %arg0, %arg1, %c0_i32, %c0_i32_0, %c0_i32_1 : i32, i32, i32, i32, i32
  }
  func.func @transform_1(%arg0: i32, %arg1: i32) -> (i32, i32) {
    %c0_i32 = arith.constant 0 : i32
    %c0_i32_0 = arith.constant 0 : i32
    %c0_i32_1 = arith.constant 0 : i32
    return %c0_i32, %c0_i32_0 : i32, i32
  }
  func.func @transform_2(%arg0: i32, %arg1: i32) -> (i32, i32, i32, i32, i32) {
    %c0_i32 = arith.constant 0 : i32
    %c0_i32_0 = arith.constant 0 : i32
    %c0_i32_1 = arith.constant 0 : i32
    %c0_i32_2 = arith.constant 0 : i32
    return %arg0, %arg1, %c0_i32, %c0_i32_0, %c0_i32_1 : i32, i32, i32, i32, i32
  }
}

</mosaic_0001>

<bundles_post_ra>
// kernel: tpu_custom_call.1
= control target key start
LH: loop header
LB: loop body
LE: loop exit
PB: predicated region body
PF: predicated region fallthrough
CT: control target
= control target key end

     0   :  { %7 = vsyncpa [#allocation4], 0  ;;  %s4006_s0 = inlined_call_operand.vmem [shape: f32[2,1,18,18,4], index: 0, kind: input, shape index: {}]   ;;  %s4007_s1 = inlined_call_operand.vmem [shape: f32[36,128], index: 1, kind: input, shape index: {}]   ;;  %s4008_s2 = inlined_call_operand.hbm [shape: f32[2,1,16,16,128], index: 2, kind: output, shape index: {}]  }
   0x1   :  { %9 = vsyncpa [#allocation4 + $0x1], 0  ;;  %s2817_s9 = smov 0   ;;  %s2819_s10 = smov 0  }
   0x2   :  { %s2821_s11 = smov 0   ;;  %s2823_s12 = smov 0  }
   0x3   :  { %s2825_s13 = smov 0   ;;  %s2827_s14 = smov 0  }
   0x4 LB: > { %s2306_s15 = sadd.s32 4294967295, %s2790_s14   ;;  %s2307_s16 = sadd.s32 4294967294, %s2790_s14   ;;  %s2790_s14 = sphi %s2827_s14, %s15_s14   ;;  %s2786_s13 = sphi %s2825_s13, %s4046_s13   ;;  %s2782_s12 = sphi %s2823_s12, %s4045_s12   ;;  %s2778_s11 = sphi %s2821_s11, %s4044_s11   ;;  %s2774_s10 = sphi %s2819_s10, %s4043_s10   ;;  %s2770_s9 = sphi %s2817_s9, %s4042_s9  }
   0x5   : > { %s27_s17 = sadd.s32 1, %s2786_s13  ;;  %s85_s18 = sadd.s32 1, %s2778_s11 }
   0x6   : > { %p29_p0 = scmp.ge.s32.totalorder %s27_s17, 2  ;;  %p95_p1 = scmp.ne.s32.totalorder %s2778_s11, %s2774_s10 }
   0x7   : > { %p96_p2 = scmp.eq.s32.totalorder %s2306_s15, 1  ;;  %p101_p3 = scmp.ne.s32.totalorder %s2774_s10, %s2770_s9 }
   0x8   : > { %s4048_s17 = smov (%p29_p0, %s27_s17), 0  ;;  %p102_p5 = scmp.eq.s32.totalorder %s2307_s16, 1 }
   0x9   : > { %p2857_p4 = por %p96_p2, %p95_p1  ;;  %s80_s20 = ssub.s32 %s2786_s13, %s4048_s17 }
   0xa   : > { %p2310_p6 = scmp.ge.s32.totalorder %s2790_s14, 1  ;;  %p83_p7 = scmp.eq.s32.totalorder %s80_s20, 0 }
   0xb   : > { %p2864_p8 = por %p102_p5, %p101_p3  ;;  %p135_p9 = scmp.lt.s32.totalorder %s2790_s14, 3 }
   0xc   : > { %s2870_s22 = scalar_select %p83_p7, %s2778_s11, %s85_s18  }
   0xd   : > { %p136_p10 = pnand %p2310_p6, %p135_p9 }
   0xf   : > { %139 = sbr.rel (%p136_p10) target bundleno = 871 (0x367), region = 28 }
  0x14   : > { %p161_p11 = scmp.lt.s32.totalorder %s2782_s12, 1  ;;  %s2792_s28 = smov 4   ;;  %vm202_vm0 = vcmask 31744   ;;  %vm395_vm1 = vcmask 64544   ;;  %vm588_vm2 = vcmask 97344   ;;  %vm782_vm3 = vcmask 130144  }
  0x15   : > { %s2793_s29 = smov 8   ;;  %s2794_s30 = smov 12   ;;  %vm1915_vm4 = vcmask 1043456   ;;  %vm975_vm5 = vcmask 162944   ;;  %vm1168_vm6 = vcmask 195744   ;;  %vm1362_vm7 = vcmask 228544  }
  0x16   : > { %s162_s23 = scalar_select %p161_p11, %s2782_s12, 1  ;;  %vm1555_vm8 = vcmask 261344   ;;  %vm1748_vm9 = vcmask 294144   ;;  %vm1818_vm10 = vcmask 293888  }
  0x17   : > { %s2795_s3 = smov 16   ;;  %s2796_s4 = smov 20  }
  0x18   : > { %s2649_s24 = smul.u32 432, %s162_s23  ;;  %s2797_s5 = smov 24  }
  0x19   : > { %s2798_s6 = smov 28   ;;  %s2799_s18 = smov 32  }
  0x1a   : > { %s2877_s27 = scalar_lea.vmem %s4006_s0, %s2649_s24  ;;  %s2800_s16 = smov [#allocation3]  }
  0x1b   : > { %v2880_v0 = vld [vmem:[%s2877_s27 + $0x19] sm:$0xff]  ;;  %v235_v1 = vld [vmem:[%s2877_s27 + $0x1] sm:$0xff]  ;;  %v236_v3 = vld [vmem:[%s2877_s27 + $0x9] sm:$0xff] }
  0x1c   : > { %303 = vrot.lane.b32.xlu1 %v2880_v0, %s2792_s28  ;;  %299 = vrot.lane.b32.xlu0 %v235_v1, %s2792_s28  ;;  %v2887_v2 = vld [vmem:[%s2877_s27 + $0x21] sm:$0xff]  ;;  %v2894_v4 = vld [vmem:[%s2877_s27 + $0x39] sm:$0xff] }
  0x1d   : > { %v2897_v5 = vld [vmem:[%s2877_s27 + $0x31] sm:$0xff]  ;;  %v2907_v7 = vld [vmem:[%s2877_s27 + $0x49] sm:$0xff]  ;;  %v2917_v9 = vld [vmem:[%s2877_s27 + $0x61] sm:$0xff] }
  0x1e   : > { %v2904_v6 = vld [vmem:[%s2877_s27 + $0x51] sm:$0xff]  ;;  %v2914_v8 = vld [vmem:[%s2877_s27 + $0x69] sm:$0xff]  ;;  %v2924_v10 = vld [vmem:[%s2877_s27 + $0x81] sm:$0xff] }
  0x1f   : > { %v2927_v11 = vld [vmem:[%s2877_s27 + $0x79] sm:$0xff]  ;;  %v2941_v15 = vld [vmem:[%s2877_s27 + $0x91] sm:$0xff]  ;;  %v171_v17 = vld [vmem:[%s2877_s27 + $0x8] sm:$0xff] }
  0x20   : > { %305 = vrot.lane.b32.xlu1 %v2887_v2, %s2792_s28  ;;  %301 = vrot.lane.b32.xlu0 %v236_v3, %s2792_s28  ;;  %v2934_v12 = vld [vmem:[%s2877_s27 + $0x18] sm:$0xff]  ;;  %v170_v13 = vld [vmem:[%s2877_s27] sm:$0xff]  ;;  %204 = vst.msk [vmem:[#allocation2 + $0x8] sm:$0xff] %vm202_vm0, %v171_v17 }
  0x21   : > { %v2938_v14 = vld [vmem:[%s2877_s27 + $0x99] sm:$0xff]  ;;  %205 = vst.msk [vmem:[#allocation2 + $0x10] sm:$0xff] %vm202_vm0, %v2934_v12  ;;  %203 = vst.msk [vmem:[#allocation2] sm:$0xff] %vm202_vm0, %v170_v13  ;;  %v250_v18 = vld [vmem:[%s2877_s27 + $0xb1] sm:$0xff] }
  0x22   : > { %v2947_v16 = vld [vmem:[%s2877_s27 + $0x20] sm:$0xff]  ;;  %v2955_v19 = vld [vmem:[%s2877_s27 + $0x38] sm:$0xff]  ;;  %v2958_v20 = vld [vmem:[%s2877_s27 + $0x30] sm:$0xff] }
  0x23   : > { %206 = vst.msk [vmem:[#allocation2 + $0x18] sm:$0xff] %vm202_vm0, %v2947_v16  ;;  %v249_v21 = vld [vmem:[%s2877_s27 + $0xa9] sm:$0xff]  ;;  %208 = vst.msk [vmem:[#allocation2 + $0x28] sm:$0xff] %vm202_vm0, %v2955_v19  ;;  %v2981_v25 = vld [vmem:[%s2877_s27 + $0x60] sm:$0xff] }
  0x24   : > { %309 = vrot.lane.b32.xlu1 %v2894_v4, %s2792_s28  ;;  %307 = vrot.lane.b32.xlu0 %v2897_v5, %s2792_s28  ;;  %207 = vst.msk [vmem:[#allocation2 + $0x20] sm:$0xff] %vm202_vm0, %v2958_v20  ;;  %v2970_v22 = vld [vmem:[%s2877_s27 + $0x50] sm:$0xff]  ;;  %v2975_v23 = vld [vmem:[%s2877_s27 + $0x48] sm:$0xff]  ;;  %211 = vst.msk [vmem:[#allocation2 + $0x40] sm:$0xff] %vm202_vm0, %v2981_v25 }
  0x25   : > { %210 = vst.msk [vmem:[#allocation2 + $0x38] sm:$0xff] %vm202_vm0, %v2970_v22  ;;  %v2978_v24 = vld [vmem:[%s2877_s27 + $0x68] sm:$0xff]  ;;  %209 = vst.msk [vmem:[#allocation2 + $0x30] sm:$0xff] %vm202_vm0, %v2975_v23  ;;  %v2990_v26 = vld [vmem:[%s2877_s27 + $0x80] sm:$0xff] }
  0x26   : > { %212 = vst.msk [vmem:[#allocation2 + $0x48] sm:$0xff] %vm202_vm0, %v2978_v24  ;;  %v2993_v27 = vld [vmem:[%s2877_s27 + $0x78] sm:$0xff]  ;;  %v252_v29 = vld [vmem:[%s2877_s27 + $0xc9] sm:$0xff]  ;;  %v251_v30 = vld [vmem:[%s2877_s27 + $0xc1] sm:$0xff] }
  0x27   : > { %v2996_v28 = vld [vmem:[%s2877_s27 + $0x98] sm:$0xff]  ;;  %214 = vst.msk [vmem:[#allocation2 + $0x58] sm:$0xff] %vm202_vm0, %v2990_v26  ;;  %213 = vst.msk [vmem:[#allocation2 + $0x50] sm:$0xff] %vm202_vm0, %v2993_v27  ;;  %v3007_v31 = vld [vmem:[%s2877_s27 + $0x90] sm:$0xff] }
  0x28   : > { %313 = vrot.lane.b32.xlu1 %v2904_v6, %s2792_s28  ;;  %311 = vrot.lane.b32.xlu0 %v2907_v7, %s2792_s28  ;;  %216 = vst.msk [vmem:[#allocation2 + $0x68] sm:$0xff] %vm202_vm0, %v2996_v28  ;;  %v3010_v32 = vld [vmem:[%s2877_s27 + $0xb0] sm:$0xff]  ;;  %v3013_v33 = vld [vmem:[%s2877_s27 + $0xa8] sm:$0xff]  ;;  %215 = vst.msk [vmem:[#allocation2 + $0x60] sm:$0xff] %vm202_vm0, %v3007_v31 }
  0x29   : > { %218 = vst.msk [vmem:[#allocation2 + $0x78] sm:$0xff] %vm202_vm0, %v3010_v32  ;;  %217 = vst.msk [vmem:[#allocation2 + $0x70] sm:$0xff] %vm202_vm0, %v3013_v33  ;;  %v3024_v34 = vld [vmem:[%s2877_s27 + $0xc8] sm:$0xff]  ;;  %v3027_v35 = vld [vmem:[%s2877_s27 + $0xc0] sm:$0xff] }
  0x2a   : > { %220 = vst.msk [vmem:[#allocation2 + $0x88] sm:$0xff] %vm202_vm0, %v3024_v34  ;;  %219 = vst.msk [vmem:[#allocation2 + $0x80] sm:$0xff] %vm202_vm0, %v3027_v35  ;;  %v3034_v36 = vld [vmem:[%s2877_s27 + $0xe0] sm:$0xff]  ;;  %v3037_v37 = vld [vmem:[%s2877_s27 + $0xd8] sm:$0xff] }
  0x2b   : > { %v3040_v38 = vld [vmem:[%s2877_s27 + $0xf8] sm:$0xff]  ;;  %222 = vst.msk [vmem:[#allocation2 + $0x98] sm:$0xff] %vm202_vm0, %v3034_v36  ;;  %221 = vst.msk [vmem:[#allocation2 + $0x90] sm:$0xff] %vm202_vm0, %v3037_v37  ;;  %v3049_v39 = vld [vmem:[%s2877_s27 + $0xf0] sm:$0xff] }
  0x2c   : > { %317 = vrot.lane.b32.xlu1 %v2914_v8, %s2792_s28  ;;  %315 = vrot.lane.b32.xlu0 %v2917_v9, %s2792_s28  ;;  %224 = vst.msk [vmem:[#allocation2 + $0xa8] sm:$0xff] %vm202_vm0, %v3040_v38  ;;  %v3052_v40 = vld [vmem:[%s2877_s27 + $0x110] sm:$0xff]  ;;  %v3055_v41 = vld [vmem:[%s2877_s27 + $0x108] sm:$0xff]  ;;  %223 = vst.msk [vmem:[#allocation2 + $0xa0] sm:$0xff] %vm202_vm0, %v3049_v39 }
  0x2d   : > { %226 = vst.msk [vmem:[#allocation2 + $0xb8] sm:$0xff] %vm202_vm0, %v3052_v40  ;;  %225 = vst.msk [vmem:[#allocation2 + $0xb0] sm:$0xff] %vm202_vm0, %v3055_v41  ;;  %v3066_v42 = vld [vmem:[%s2877_s27 + $0xe1] sm:$0xff]  ;;  %v3069_v43 = vld [vmem:[%s2877_s27 + $0xd9] sm:$0xff] }
  0x2e   : > { %v3072_v44 = vld [vmem:[%s2877_s27 + $0x128] sm:$0xff]  ;;  %v3075_v45 = vld [vmem:[%s2877_s27 + $0x120] sm:$0xff]  ;;  %v3089_v47 = vld [vmem:[%s2877_s27 + $0xf1] sm:$0xff] }
  0x2f   : > { %228 = vst.msk [vmem:[#allocation2 + $0xc8] sm:$0xff] %vm202_vm0, %v3072_v44  ;;  %227 = vst.msk [vmem:[#allocation2 + $0xc0] sm:$0xff] %vm202_vm0, %v3075_v45  ;;  %v3086_v46 = vld [vmem:[%s2877_s27 + $0xf9] sm:$0xff]  ;;  %v3106_v50 = vld [vmem:[%s2877_s27 + $0x111] sm:$0xff] }
  0x30   : > { %321 = vrot.lane.b32.xlu1 %v2924_v10, %s2792_s28  ;;  %319 = vrot.lane.b32.xlu0 %v2927_v11, %s2792_s28  ;;  %v3092_v48 = vld [vmem:[%s2877_s27 + $0x140] sm:$0xff]  ;;  %v3095_v49 = vld [vmem:[%s2877_s27 + $0x138] sm:$0xff]  ;;  %4026 = vst [vmem:[#allocation6_spill] sm:$0xff] %v3106_v50 }
  0x31   : > { %230 = vst.msk [vmem:[#allocation2 + $0xd8] sm:$0xff] %vm202_vm0, %v3092_v48  ;;  %229 = vst.msk [vmem:[#allocation2 + $0xd0] sm:$0xff] %vm202_vm0, %v3095_v49  ;;  %v3109_v51 = vld [vmem:[%s2877_s27 + $0x109] sm:$0xff]  ;;  %v3112_v52 = vld [vmem:[%s2877_s27 + $0x158] sm:$0xff] }
  0x32   : > { %4027 = vst [vmem:[#allocation7_spill] sm:$0xff] %v3109_v51  ;;  %v3115_v53 = vld [vmem:[%s2877_s27 + $0x150] sm:$0xff]  ;;  %232 = vst.msk [vmem:[#allocation2 + $0xe8] sm:$0xff] %vm202_vm0, %v3112_v52  ;;  %v259_v55 = vld [vmem:[%s2877_s27 + $0x121] sm:$0xff] }
  0x33   : > { %231 = vst.msk [vmem:[#allocation2 + $0xe0] sm:$0xff] %vm202_vm0, %v3115_v53  ;;  %v260_v54 = vld [vmem:[%s2877_s27 + $0x129] sm:$0xff]  ;;  %v262_v58 = vld [vmem:[%s2877_s27 + $0x141] sm:$0xff]  ;;  %v261_v59 = vld [vmem:[%s2877_s27 + $0x139] sm:$0xff] }
  0x34   : > { %325 = vrot.lane.b32.xlu1 %v2938_v14, %s2792_s28  ;;  %323 = vrot.lane.b32.xlu0 %v2941_v15, %s2792_s28  ;;  %v3128_v56 = vld [vmem:[%s2877_s27 + $0x170] sm:$0xff]  ;;  %v3131_v57 = vld [vmem:[%s2877_s27 + $0x168] sm:$0xff] }
  0x35   : > { %234 = vst.msk [vmem:[#allocation2 + $0xf8] sm:$0xff] %vm202_vm0, %v3128_v56  ;;  %233 = vst.msk [vmem:[#allocation2 + $0xf0] sm:$0xff] %vm202_vm0, %v3131_v57  ;;  %v264_v60 = vld [vmem:[%s2877_s27 + $0x159] sm:$0xff]  ;;  %v263_v61 = vld [vmem:[%s2877_s27 + $0x151] sm:$0xff] }
  0x36   : > { %v266_v62 = vld [vmem:[%s2877_s27 + $0x171] sm:$0xff]  ;;  %v265_v63 = vld [vmem:[%s2877_s27 + $0x169] sm:$0xff]  ;;  %v3159_v17 = vld [vmem:[%s2877_s27 + $0x1a] sm:$0xff] }
  0x37   : > { %v429_v1 = vld [vmem:[%s2877_s27 + $0xa] sm:$0xff]  ;;  %v428_v3 = vld [vmem:[%s2877_s27 + $0x2] sm:$0xff] }
  0x38   : > { %329 = vrot.lane.b32.xlu1 %v250_v18, %s2792_s28  ;;  %327 = vrot.lane.b32.xlu0 %v249_v21, %s2792_s28  ;;  %v3156_v13 = vld [vmem:[%s2877_s27 + $0x22] sm:$0xff]  ;;  %v3166_v18 = vld [vmem:[%s2877_s27 + $0x3a] sm:$0xff] }
  0x39   : > { %v3169_v21 = vld [vmem:[%s2877_s27 + $0x32] sm:$0xff] }
  0x3c   : > { %333 = vrot.lane.b32.xlu1 %v252_v29, %s2792_s28  ;;  %331 = vrot.lane.b32.xlu0 %v251_v30, %s2792_s28  ;;  %v3176_v29 = vld [vmem:[%s2877_s27 + $0x52] sm:$0xff]  ;;  %v3179_v30 = vld [vmem:[%s2877_s27 + $0x4a] sm:$0xff] }
  0x3d   : > { %4028 = vst [vmem:[#allocation8_spill] sm:$0xff] %v3176_v29  ;;  %4029 = vst [vmem:[#allocation9_spill] sm:$0xff] %v3179_v30 }
  0x40   : > { %337 = vrot.lane.b32.xlu1 %v3066_v42, %s2792_s28  ;;  %335 = vrot.lane.b32.xlu0 %v3069_v43, %s2792_s28 }
  0x44   : > { %341 = vrot.lane.b32.xlu1 %v3086_v46, %s2792_s28  ;;  %339 = vrot.lane.b32.xlu0 %v3089_v47, %s2792_s28 }
  0x48   : > { %345 = vrot.lane.b32.xlu1 %v3106_v50, %s2792_s28  ;;  %343 = vrot.lane.b32.xlu0 %v3109_v51, %s2792_s28 }
  0x4c   : > { %349 = vrot.lane.b32.xlu1 %v260_v54, %s2792_s28  ;;  %347 = vrot.lane.b32.xlu0 %v259_v55, %s2792_s28  ;;  %v437_v54 = vld [vmem:[%s2877_s27 + $0x6a] sm:$0xff]  ;;  %v436_v55 = vld [vmem:[%s2877_s27 + $0x62] sm:$0xff] }
  0x50   : > { %353 = vrot.lane.b32.xlu1 %v262_v58, %s2792_s28  ;;  %351 = vrot.lane.b32.xlu0 %v261_v59, %s2792_s28  ;;  %v439_v58 = vld [vmem:[%s2877_s27 + $0x82] sm:$0xff]  ;;  %v438_v59 = vld [vmem:[%s2877_s27 + $0x7a] sm:$0xff] }
  0x54   : > { %357 = vrot.lane.b32.xlu1 %v264_v60, %s2792_s28  ;;  %355 = vrot.lane.b32.xlu0 %v263_v61, %s2792_s28  ;;  %v441_v60 = vld [vmem:[%s2877_s27 + $0x9a] sm:$0xff]  ;;  %v440_v61 = vld [vmem:[%s2877_s27 + $0x92] sm:$0xff] }
  0x58   : > { %361 = vrot.lane.b32.xlu1 %v266_v62, %s2792_s28  ;;  %359 = vrot.lane.b32.xlu0 %v265_v63, %s2792_s28  ;;  %v443_v62 = vld [vmem:[%s2877_s27 + $0xb2] sm:$0xff]  ;;  %v442_v63 = vld [vmem:[%s2877_s27 + $0xaa] sm:$0xff] }
  0x5c   : > { %494 = vrot.lane.b32.xlu1 %v429_v1, %s2793_s29  ;;  %492 = vrot.lane.b32.xlu0 %v428_v3, %s2793_s29  ;;  %v445_v1 = vld [vmem:[%s2877_s27 + $0xca] sm:$0xff]  ;;  %v444_v3 = vld [vmem:[%s2877_s27 + $0xc2] sm:$0xff] }
  0x60   : > { %498 = vrot.lane.b32.xlu1 %v3156_v13, %s2793_s29  ;;  %496 = vrot.lane.b32.xlu0 %v3159_v17, %s2793_s29 }
  0x64   : > { %502 = vrot.lane.b32.xlu1 %v3166_v18, %s2793_s29  ;;  %500 = vrot.lane.b32.xlu0 %v3169_v21, %s2793_s29 }
  0x68   : > { %506 = vrot.lane.b32.xlu1 %v3176_v29, %s2793_s29  ;;  %504 = vrot.lane.b32.xlu0 %v3179_v30, %s2793_s29 }
  0x6c   : > { %510 = vrot.lane.b32.xlu1 %v437_v54, %s2793_s29  ;;  %508 = vrot.lane.b32.xlu0 %v436_v55, %s2793_s29  ;;  %v3206_v54 = vld [vmem:[%s2877_s27 + $0xe2] sm:$0xff]  ;;  %v3209_v55 = vld [vmem:[%s2877_s27 + $0xda] sm:$0xff] }
  0x70   : > { %514 = vrot.lane.b32.xlu1 %v439_v58, %s2793_s29  ;;  %512 = vrot.lane.b32.xlu0 %v438_v59, %s2793_s29  ;;  %v3216_v58 = vld [vmem:[%s2877_s27 + $0xfa] sm:$0xff]  ;;  %v3219_v59 = vld [vmem:[%s2877_s27 + $0xf2] sm:$0xff] }
  0x74   : > { %518 = vrot.lane.b32.xlu1 %v441_v60, %s2793_s29  ;;  %516 = vrot.lane.b32.xlu0 %v440_v61, %s2793_s29  ;;  %v3226_v60 = vld [vmem:[%s2877_s27 + $0x112] sm:$0xff]  ;;  %v3229_v61 = vld [vmem:[%s2877_s27 + $0x10a] sm:$0xff] }
  0x75   : > { %4030 = vst [vmem:[#allocation10_spill] sm:$0xff] %v3226_v60  ;;  %4031 = vst [vmem:[#allocation11_spill] sm:$0xff] %v3229_v61 }
  0x78   : > { %522 = vrot.lane.b32.xlu1 %v443_v62, %s2793_s29  ;;  %520 = vrot.lane.b32.xlu0 %v442_v63, %s2793_s29  ;;  %v3236_v62 = vld [vmem:[%s2877_s27 + $0x12a] sm:$0xff]  ;;  %v3239_v63 = vld [vmem:[%s2877_s27 + $0x122] sm:$0xff] }
  0x79   : > { %4032 = vst [vmem:[#allocation12_spill] sm:$0xff] %v3236_v62  ;;  %4033 = vst [vmem:[#allocation13_spill] sm:$0xff] %v3239_v63 }
  0x7c   : > { %526 = vrot.lane.b32.xlu1 %v445_v1, %s2793_s29  ;;  %524 = vrot.lane.b32.xlu0 %v444_v3, %s2793_s29  ;;  %v455_v1 = vld [vmem:[%s2877_s27 + $0x142] sm:$0xff]  ;;  %v454_v3 = vld [vmem:[%s2877_s27 + $0x13a] sm:$0xff] }
  0x80   : > { %530 = vrot.lane.b32.xlu1 %v3206_v54, %s2793_s29  ;;  %528 = vrot.lane.b32.xlu0 %v3209_v55, %s2793_s29 }
  0x84   : > { %534 = vrot.lane.b32.xlu1 %v3216_v58, %s2793_s29  ;;  %532 = vrot.lane.b32.xlu0 %v3219_v59, %s2793_s29 }
  0x88   : > { %538 = vrot.lane.b32.xlu1 %v3226_v60, %s2793_s29  ;;  %536 = vrot.lane.b32.xlu0 %v3229_v61, %s2793_s29  ;;  %v457_v61 = vld [vmem:[%s2877_s27 + $0x15a] sm:$0xff] }
  0x8c   : > { %542 = vrot.lane.b32.xlu1 %v3236_v62, %s2793_s29  ;;  %540 = vrot.lane.b32.xlu0 %v3239_v63, %s2793_s29  ;;  %v456_v62 = vld [vmem:[%s2877_s27 + $0x152] sm:$0xff] }
  0x8d   : > { %v459_v63 = vld [vmem:[%s2877_s27 + $0x172] sm:$0xff] }
  0x8e   : > { %v304_v29 = vpop.permute.xlu1 %303  ;;  %v300_v60 = vpop.permute.xlu0 %299 }
  0x8f   : > { %398 = vst.msk [vmem:[#allocation2 + $0x10] sm:$0xff] %vm395_vm1, %v304_v29  ;;  %396 = vst.msk [vmem:[#allocation2] sm:$0xff] %vm395_vm1, %v300_v60  ;;  %v458_v29 = vld [vmem:[%s2877_s27 + $0x16a] sm:$0xff] }
  0x90   : > { %546 = vrot.lane.b32.xlu1 %v455_v1, %s2793_s29  ;;  %544 = vrot.lane.b32.xlu0 %v454_v3, %s2793_s29 }
  0x92   : > { %v306_v50 = vpop.permute.xlu1 %305  ;;  %v302_v30 = vpop.permute.xlu0 %301 }
  0x93   : > { %399 = vst.msk [vmem:[#allocation2 + $0x18] sm:$0xff] %vm395_vm1, %v306_v50  ;;  %397 = vst.msk [vmem:[#allocation2 + $0x8] sm:$0xff] %vm395_vm1, %v302_v30 }
  0x94   : > { %550 = vrot.lane.b32.xlu1 %v457_v61, %s2793_s29  ;;  %548 = vrot.lane.b32.xlu0 %v456_v62, %s2793_s29 }
  0x96   : > { %v310_v51 = vpop.permute.xlu1 %309  ;;  %v308_v60 = vpop.permute.xlu0 %307 }
  0x97   : > { %401 = vst.msk [vmem:[#allocation2 + $0x28] sm:$0xff] %vm395_vm1, %v310_v51  ;;  %400 = vst.msk [vmem:[#allocation2 + $0x20] sm:$0xff] %vm395_vm1, %v308_v60 }
  0x98   : > { %554 = vrot.lane.b32.xlu1 %v459_v63, %s2793_s29  ;;  %552 = vrot.lane.b32.xlu0 %v458_v29, %s2793_s29 }
  0x9a   : > { %v314_v1 = vpop.permute.xlu1 %313  ;;  %v312_v50 = vpop.permute.xlu0 %311 }
  0x9b   : > { %403 = vst.msk [vmem:[#allocation2 + $0x38] sm:$0xff] %vm395_vm1, %v314_v1  ;;  %402 = vst.msk [vmem:[#allocation2 + $0x30] sm:$0xff] %vm395_vm1, %v312_v50 }
  0x9c   : > { %688 = vrot.lane.b32.xlu1 %v2947_v16, %s2794_s30  ;;  %686 = vrot.lane.b32.xlu0 %v2934_v12, %s2794_s30 }
  0x9e   : > { %v318_v51 = vpop.permute.xlu1 %317  ;;  %v316_v30 = vpop.permute.xlu0 %315 }
  0x9f   : > { %405 = vst.msk [vmem:[#allocation2 + $0x48] sm:$0xff] %vm395_vm1, %v318_v51  ;;  %404 = vst.msk [vmem:[#allocation2 + $0x40] sm:$0xff] %vm395_vm1, %v316_v30 }
  0xa0   : > { %692 = vrot.lane.b32.xlu1 %v2955_v19, %s2794_s30  ;;  %690 = vrot.lane.b32.xlu0 %v2958_v20, %s2794_s30 }
  0xa2   : > { %v322_v61 = vpop.permute.xlu1 %321  ;;  %v320_v62 = vpop.permute.xlu0 %319 }
  0xa3   : > { %407 = vst.msk [vmem:[#allocation2 + $0x58] sm:$0xff] %vm395_vm1, %v322_v61  ;;  %406 = vst.msk [vmem:[#allocation2 + $0x50] sm:$0xff] %vm395_vm1, %v320_v62 }
  0xa4   : > { %696 = vrot.lane.b32.xlu1 %v2970_v22, %s2794_s30  ;;  %694 = vrot.lane.b32.xlu0 %v2975_v23, %s2794_s30 }
  0xa6   : > { %v326_v12 = vpop.permute.xlu1 %325  ;;  %v324_v16 = vpop.permute.xlu0 %323 }
  0xa7   : > { %409 = vst.msk [vmem:[#allocation2 + $0x68] sm:$0xff] %vm395_vm1, %v326_v12  ;;  %408 = vst.msk [vmem:[#allocation2 + $0x60] sm:$0xff] %vm395_vm1, %v324_v16 }
  0xa8   : > { %700 = vrot.lane.b32.xlu1 %v2978_v24, %s2794_s30  ;;  %698 = vrot.lane.b32.xlu0 %v2981_v25, %s2794_s30 }
  0xaa   : > { %v330_v63 = vpop.permute.xlu1 %329  ;;  %v328_v3 = vpop.permute.xlu0 %327 }
  0xab   : > { %411 = vst.msk [vmem:[#allocation2 + $0x78] sm:$0xff] %vm395_vm1, %v330_v63  ;;  %410 = vst.msk [vmem:[#allocation2 + $0x70] sm:$0xff] %vm395_vm1, %v328_v3 }
  0xac   : > { %704 = vrot.lane.b32.xlu1 %v2990_v26, %s2794_s30  ;;  %702 = vrot.lane.b32.xlu0 %v2993_v27, %s2794_s30 }
  0xae   : > { %v334_v29 = vpop.permute.xlu1 %333  ;;  %v332_v60 = vpop.permute.xlu0 %331 }
  0xaf   : > { %413 = vst.msk [vmem:[#allocation2 + $0x88] sm:$0xff] %vm395_vm1, %v334_v29  ;;  %412 = vst.msk [vmem:[#allocation2 + $0x80] sm:$0xff] %vm395_vm1, %v332_v60  ;;  %v2344_v29 = vld [vmem:[%s2877_s27 + $0x188] sm:$0xff]  ;;  %v2343_v60 = vld [vmem:[%s2877_s27 + $0x180] sm:$0xff] }
  0xb0   : > { %708 = vrot.lane.b32.xlu1 %v2996_v28, %s2794_s30  ;;  %706 = vrot.lane.b32.xlu0 %v3007_v31, %s2794_s30 }
  0xb2   : > { %v338_v1 = vpop.permute.xlu1 %337  ;;  %v336_v50 = vpop.permute.xlu0 %335 }
  0xb3   : > { %415 = vst.msk [vmem:[#allocation2 + $0x98] sm:$0xff] %vm395_vm1, %v338_v1  ;;  %414 = vst.msk [vmem:[#allocation2 + $0x90] sm:$0xff] %vm395_vm1, %v336_v50 }
  0xb4   : > { %712 = vrot.lane.b32.xlu1 %v3010_v32, %s2794_s30  ;;  %710 = vrot.lane.b32.xlu0 %v3013_v33, %s2794_s30 }
  0xb6   : > { %v342_v51 = vpop.permute.xlu1 %341  ;;  %v340_v30 = vpop.permute.xlu0 %339 }
  0xb7   : > { %417 = vst.msk [vmem:[#allocation2 + $0xa8] sm:$0xff] %vm395_vm1, %v342_v51  ;;  %416 = vst.msk [vmem:[#allocation2 + $0xa0] sm:$0xff] %vm395_vm1, %v340_v30 }
  0xb8   : > { %716 = vrot.lane.b32.xlu1 %v3024_v34, %s2794_s30  ;;  %714 = vrot.lane.b32.xlu0 %v3027_v35, %s2794_s30 }
  0xba   : > { %v346_v28 = vpop.permute.xlu1 %345  ;;  %v344_v31 = vpop.permute.xlu0 %343 }
  0xbb   : > { %419 = vst.msk [vmem:[#allocation2 + $0xb8] sm:$0xff] %vm395_vm1, %v346_v28  ;;  %418 = vst.msk [vmem:[#allocation2 + $0xb0] sm:$0xff] %vm395_vm1, %v344_v31 }
  0xbc   : > { %720 = vrot.lane.b32.xlu1 %v3034_v36, %s2794_s30  ;;  %718 = vrot.lane.b32.xlu0 %v3037_v37, %s2794_s30 }
  0xbe   : > { %v350_v32 = vpop.permute.xlu1 %349  ;;  %v348_v33 = vpop.permute.xlu0 %347 }
  0xbf   : > { %421 = vst.msk [vmem:[#allocation2 + $0xc8] sm:$0xff] %vm395_vm1, %v350_v32  ;;  %420 = vst.msk [vmem:[#allocation2 + $0xc0] sm:$0xff] %vm395_vm1, %v348_v33 }
  0xc0   : > { %724 = vrot.lane.b32.xlu1 %v3040_v38, %s2794_s30  ;;  %722 = vrot.lane.b32.xlu0 %v3049_v39, %s2794_s30 }
  0xc2   : > { %v354_v34 = vpop.permute.xlu1 %353  ;;  %v352_v35 = vpop.permute.xlu0 %351 }
  0xc3   : > { %423 = vst.msk [vmem:[#allocation2 + $0xd8] sm:$0xff] %vm395_vm1, %v354_v34  ;;  %422 = vst.msk [vmem:[#allocation2 + $0xd0] sm:$0xff] %vm395_vm1, %v352_v35 }
  0xc4   : > { %728 = vrot.lane.b32.xlu1 %v3052_v40, %s2794_s30  ;;  %726 = vrot.lane.b32.xlu0 %v3055_v41, %s2794_s30 }
  0xc6   : > { %v358_v36 = vpop.permute.xlu1 %357  ;;  %v356_v37 = vpop.permute.xlu0 %355 }
  0xc7   : > { %425 = vst.msk [vmem:[#allocation2 + $0xe8] sm:$0xff] %vm395_vm1, %v358_v36  ;;  %424 = vst.msk [vmem:[#allocation2 + $0xe0] sm:$0xff] %vm395_vm1, %v356_v37  ;;  %v1816_v36 = vld [vmem:[%s4007_s1 + $0x18] sm:$0xff] }
  0xc8   : > { %732 = vrot.lane.b32.xlu1 %v3072_v44, %s2794_s30  ;;  %730 = vrot.lane.b32.xlu0 %v3075_v45, %s2794_s30 }
  0xca   : > { %v362_v61 = vpop.permute.xlu1 %361  ;;  %v360_v62 = vpop.permute.xlu0 %359 }
  0xcb   : > { %427 = vst.msk [vmem:[#allocation2 + $0xf8] sm:$0xff] %vm395_vm1, %v362_v61  ;;  %426 = vst.msk [vmem:[#allocation2 + $0xf0] sm:$0xff] %vm395_vm1, %v360_v62  ;;  %v1814_v61 = vld [vmem:[%s4007_s1 + $0x8] sm:$0xff]  ;;  %v1813_v62 = vld [vmem:[%s4007_s1] sm:$0xff] }
  0xcc   : > { %736 = vrot.lane.b32.xlu1 %v3092_v48, %s2794_s30  ;;  %734 = vrot.lane.b32.xlu0 %v3095_v49, %s2794_s30 }
  0xce   : > { %v495_v12 = vpop.permute.xlu1 %494  ;;  %v493_v16 = vpop.permute.xlu0 %492 }
  0xcf   : > { %590 = vst.msk [vmem:[#allocation2 + $0x8] sm:$0xff] %vm588_vm2, %v495_v12  ;;  %589 = vst.msk [vmem:[#allocation2] sm:$0xff] %vm588_vm2, %v493_v16 }
  0xd0   : > { %740 = vrot.lane.b32.xlu1 %v3112_v52, %s2794_s30  ;;  %738 = vrot.lane.b32.xlu0 %v3115_v53, %s2794_s30 }
  0xd2   : > { %v499_v63 = vpop.permute.xlu1 %498  ;;  %v497_v3 = vpop.permute.xlu0 %496 }
  0xd3   : > { %592 = vst.msk [vmem:[#allocation2 + $0x18] sm:$0xff] %vm588_vm2, %v499_v63  ;;  %591 = vst.msk [vmem:[#allocation2 + $0x10] sm:$0xff] %vm588_vm2, %v497_v3 }
  0xd4   : > { %744 = vrot.lane.b32.xlu1 %v3128_v56, %s2794_s30  ;;  %742 = vrot.lane.b32.xlu0 %v3131_v57, %s2794_s30 }
  0xd6   : > { %v503_v1 = vpop.permute.xlu1 %502  ;;  %v501_v50 = vpop.permute.xlu0 %500 }
  0xd7   : > { %594 = vst.msk [vmem:[#allocation2 + $0x28] sm:$0xff] %vm588_vm2, %v503_v1  ;;  %593 = vst.msk [vmem:[#allocation2 + $0x20] sm:$0xff] %vm588_vm2, %v501_v50 }
  0xd8   : > { %748 = vrot.lane.b32.xlu1 %v2344_v29, %s2794_s30  ;;  %746 = vrot.lane.b32.xlu0 %v2343_v60, %s2794_s30 }
  0xda   : > { %v507_v51 = vpop.permute.xlu1 %506  ;;  %v505_v30 = vpop.permute.xlu0 %504 }
  0xdb   : > { %596 = vst.msk [vmem:[#allocation2 + $0x38] sm:$0xff] %vm588_vm2, %v507_v51  ;;  %595 = vst.msk [vmem:[#allocation2 + $0x30] sm:$0xff] %vm588_vm2, %v505_v30  ;;  %v4036_v51 = vld [vmem:[#allocation6_spill] sm:$0xff] }
  0xdc   : > { %881 = vrot.lane.b32.xlu1 %v2887_v2, %s2795_s3  ;;  %879 = vrot.lane.b32.xlu0 %v2880_v0, %s2795_s3 }
  0xde   : > { %v511_v56 = vpop.permute.xlu1 %510  ;;  %v509_v57 = vpop.permute.xlu0 %508 }
  0xdf   : > { %598 = vst.msk [vmem:[#allocation2 + $0x48] sm:$0xff] %vm588_vm2, %v511_v56  ;;  %597 = vst.msk [vmem:[#allocation2 + $0x40] sm:$0xff] %vm588_vm2, %v509_v57 }
  0xe0   : > { %885 = vrot.lane.b32.xlu1 %v2894_v4, %s2795_s3  ;;  %883 = vrot.lane.b32.xlu0 %v2897_v5, %s2795_s3 }
  0xe2   : > { %v515_v28 = vpop.permute.xlu1 %514  ;;  %v513_v31 = vpop.permute.xlu0 %512 }
  0xe3   : > { %600 = vst.msk [vmem:[#allocation2 + $0x58] sm:$0xff] %vm588_vm2, %v515_v28  ;;  %599 = vst.msk [vmem:[#allocation2 + $0x50] sm:$0xff] %vm588_vm2, %v513_v31 }
  0xe4   : > { %889 = vrot.lane.b32.xlu1 %v2904_v6, %s2795_s3  ;;  %887 = vrot.lane.b32.xlu0 %v2907_v7, %s2795_s3 }
  0xe6   : > { %v519_v0 = vpop.permute.xlu1 %518  ;;  %v517_v2 = vpop.permute.xlu0 %516 }
  0xe7   : > { %602 = vst.msk [vmem:[#allocation2 + $0x68] sm:$0xff] %vm588_vm2, %v519_v0  ;;  %601 = vst.msk [vmem:[#allocation2 + $0x60] sm:$0xff] %vm588_vm2, %v517_v2  ;;  %v4038_v2 = vld [vmem:[#allocation10_spill] sm:$0xff] }
  0xe8   : > { %893 = vrot.lane.b32.xlu1 %v2914_v8, %s2795_s3  ;;  %891 = vrot.lane.b32.xlu0 %v2917_v9, %s2795_s3 }
  0xea   : > { %v523_v32 = vpop.permute.xlu1 %522  ;;  %v521_v33 = vpop.permute.xlu0 %520 }
  0xeb   : > { %604 = vst.msk [vmem:[#allocation2 + $0x78] sm:$0xff] %vm588_vm2, %v523_v32  ;;  %603 = vst.msk [vmem:[#allocation2 + $0x70] sm:$0xff] %vm588_vm2, %v521_v33  ;;  %v4039_v32 = vld [vmem:[#allocation8_spill] sm:$0xff] }
  0xec   : > { %897 = vrot.lane.b32.xlu1 %v2924_v10, %s2795_s3  ;;  %895 = vrot.lane.b32.xlu0 %v2927_v11, %s2795_s3 }
  0xee   : > { %v527_v34 = vpop.permute.xlu1 %526  ;;  %v525_v35 = vpop.permute.xlu0 %524 }
  0xef   : > { %606 = vst.msk [vmem:[#allocation2 + $0x88] sm:$0xff] %vm588_vm2, %v527_v34  ;;  %605 = vst.msk [vmem:[#allocation2 + $0x80] sm:$0xff] %vm588_vm2, %v525_v35 }
  0xf0   : > { %901 = vrot.lane.b32.xlu1 %v2938_v14, %s2795_s3  ;;  %899 = vrot.lane.b32.xlu0 %v2941_v15, %s2795_s3 }
  0xf2   : > { %v531_v8 = vpop.permute.xlu1 %530  ;;  %v529_v9 = vpop.permute.xlu0 %528 }
  0xf3   : > { %608 = vst.msk [vmem:[#allocation2 + $0x98] sm:$0xff] %vm588_vm2, %v531_v8  ;;  %607 = vst.msk [vmem:[#allocation2 + $0x90] sm:$0xff] %vm588_vm2, %v529_v9 }
  0xf4   : > { %913 = vrot.lane.b32.xlu1 %v3066_v42, %s2795_s3  ;;  %911 = vrot.lane.b32.xlu0 %v3069_v43, %s2795_s3 }
  0xf6   : > { %v535_v10 = vpop.permute.xlu1 %534  ;;  %v533_v11 = vpop.permute.xlu0 %532 }
  0xf7   : > { %610 = vst.msk [vmem:[#allocation2 + $0xa8] sm:$0xff] %vm588_vm2, %v535_v10  ;;  %609 = vst.msk [vmem:[#allocation2 + $0xa0] sm:$0xff] %vm588_vm2, %v533_v11  ;;  %v2461_v11 = vld [vmem:[%s2877_s27 + $0x121] sm:$0xff] }
  0xf8   : > { %1104 = vrot.lane.b32.xlu1 %v3209_v55, %s2796_s4  ;;  %1072 = vrot.lane.b32.xlu0 %v3159_v17, %s2796_s4 }
  0xfa   : > { %v539_v14 = vpop.permute.xlu1 %538  ;;  %v537_v15 = vpop.permute.xlu0 %536 }
  0xfb   : > { %612 = vst.msk [vmem:[#allocation2 + $0xb8] sm:$0xff] %vm588_vm2, %v539_v14  ;;  %611 = vst.msk [vmem:[#allocation2 + $0xb0] sm:$0xff] %vm588_vm2, %v537_v15  ;;  %v2446_v15 = vld [vmem:[%s2877_s27 + $0x69] sm:$0xff] }
  0xfc   : > { %1106 = vrot.lane.b32.xlu1 %v3206_v54, %s2796_s4  ;;  %1074 = vrot.lane.b32.xlu0 %v3156_v13, %s2796_s4 }
  0xfe   : > { %v543_v42 = vpop.permute.xlu1 %542  ;;  %v541_v43 = vpop.permute.xlu0 %540 }
  0xff   : > { %614 = vst.msk [vmem:[#allocation2 + $0xc8] sm:$0xff] %vm588_vm2, %v543_v42  ;;  %613 = vst.msk [vmem:[#allocation2 + $0xc0] sm:$0xff] %vm588_vm2, %v541_v43  ;;  %v2462_v43 = vld [vmem:[%s2877_s27 + $0x129] sm:$0xff] }
 0x100   : > { %1298 = vrot.lane.b32.xlu1 %v3049_v39, %s2797_s5  ;;  %1266 = vrot.lane.b32.xlu0 %v2958_v20, %s2797_s5 }
 0x102   : > { %v547_v17 = vpop.permute.xlu1 %546  ;;  %v545_v55 = vpop.permute.xlu0 %544 }
 0x103   : > { %616 = vst.msk [vmem:[#allocation2 + $0xd8] sm:$0xff] %vm588_vm2, %v547_v17  ;;  %615 = vst.msk [vmem:[#allocation2 + $0xd0] sm:$0xff] %vm588_vm2, %v545_v55 }
 0x104   : > { %1300 = vrot.lane.b32.xlu1 %v3040_v38, %s2797_s5  ;;  %1268 = vrot.lane.b32.xlu0 %v2955_v19, %s2797_s5  ;;  %v1817_v19 = vld [vmem:[%s4007_s1 + $0x20] sm:$0xf] }
 0x105   : > { %2581 = vmatprep.subr.msk.mxu0 %vm1915_vm4, %v1817_v19  ;;  %2639 = vmatprep.subr.msk.mxu1 %vm1915_vm4, %v1817_v19 }
 0x106   : > { %v551_v13 = vpop.permute.xlu1 %550  ;;  %v549_v54 = vpop.permute.xlu0 %548  ;;  %2582 = vmatpush3.msk.msra.mxu0 %vm1915_vm4, %v1817_v19  ;;  %2644 = vmatpush3.msk.msra.mxu1 %vm1915_vm4, %v1817_v19 }
 0x107   : > { %618 = vst.msk [vmem:[#allocation2 + $0xe8] sm:$0xff] %vm588_vm2, %v551_v13  ;;  %617 = vst.msk [vmem:[#allocation2 + $0xe0] sm:$0xff] %vm588_vm2, %v549_v54  ;;  %2583 = vmatprep.subr.mxu0 %v1816_v36  ;;  %2640 = vmatprep.subr.mxu1 %v1816_v36 }
 0x108   : > { %1491 = vrot.lane.b32.xlu1 %v3089_v47, %s2798_s6  ;;  %1459 = vrot.lane.b32.xlu0 %v2897_v5, %s2798_s6 }
 0x109   : > { %2584 = vmatpush3.msra.mxu0 %v1816_v36  ;;  %2645 = vmatpush3.msra.mxu1 %v1816_v36 }
 0x10a   : > { %v555_v20 = vpop.permute.xlu1 %554  ;;  %v553_v39 = vpop.permute.xlu0 %552 }
 0x10b   : > { %620 = vst.msk [vmem:[#allocation2 + $0xf8] sm:$0xff] %vm588_vm2, %v555_v20  ;;  %619 = vst.msk [vmem:[#allocation2 + $0xf0] sm:$0xff] %vm588_vm2, %v553_v39  ;;  %v4040_v20 = vld [vmem:[#allocation13_spill] sm:$0xff] }
 0x10c   : > { %1461 = vrot.lane.b32.xlu1 %v2894_v4, %s2798_s6  ;;  %915 = vrot.lane.b32.xlu0 %v3089_v47, %s2795_s3  ;;  %v1815_v4 = vld [vmem:[%s4007_s1 + $0x10] sm:$0xff] }
 0x10d   : > { %2585 = vmatprep.subr.mxu0 %v1815_v4  ;;  %2641 = vmatprep.subr.mxu1 %v1815_v4 }
 0x10e   : > { %v689_v5 = vpop.permute.xlu1 %688  ;;  %v687_v38 = vpop.permute.xlu0 %686  ;;  %2586 = vmatpush3.msra.mxu0 %v1815_v4  ;;  %2646 = vmatpush3.msra.mxu1 %v1815_v4  ;;  %v4041_v4 = vld [vmem:[#allocation12_spill] sm:$0xff] }
 0x10f   : > { %784 = vst.msk [vmem:[#allocation2 + $0x8] sm:$0xff] %vm782_vm3, %v689_v5  ;;  %783 = vst.msk [vmem:[#allocation2] sm:$0xff] %vm782_vm3, %v687_v38  ;;  %2587 = vmatprep.subr.mxu0 %v1814_v61  ;;  %2642 = vmatprep.subr.mxu1 %v1814_v61  ;;  %v2478_v5 = vld [vmem:[%s2877_s27 + $0x6a] sm:$0xff] }
 0x110   : > { %1652 = vrot.lane.b32.xlu1 %v3169_v21, %s2799_s18  ;;  %1493 = vrot.lane.b32.xlu0 %v3086_v46, %s2798_s6 }
 0x111   : > { %2588 = vmatpush3.msra.mxu0 %v1814_v61  ;;  %2647 = vmatpush3.msra.mxu1 %v1814_v61 }
 0x112   : > { %v693_v47 = vpop.permute.xlu1 %692  ;;  %v691_v37 = vpop.permute.xlu0 %690  ;;  %2589 = vmatprep.subr.mxu0 %v1813_v62  ;;  %2643 = vmatprep.subr.mxu1 %v1813_v62 }
 0x113   : > { %786 = vst.msk [vmem:[#allocation2 + $0x18] sm:$0xff] %vm782_vm3, %v693_v47  ;;  %785 = vst.msk [vmem:[#allocation2 + $0x10] sm:$0xff] %vm782_vm3, %v691_v37  ;;  %2590 = vmatpush3.msra.mxu0 %v1813_v62  ;;  %2648 = vmatpush3.msra.mxu1 %v1813_v62  ;;  %v2400_v47 = vld [vmem:[%s2877_s27 + $0x12a] sm:$0xff] }
 0x114   : > { %917 = vrot.lane.b32.xlu1 %v3086_v46, %s2795_s3  ;;  %1684 = vrot.lane.b32.xlu0 %v3219_v59, %s2799_s18 }
 0x116   : > { %v697_v12 = vpop.permute.xlu1 %696  ;;  %v695_v16 = vpop.permute.xlu0 %694 }
 0x117   : > { %788 = vst.msk [vmem:[#allocation2 + $0x28] sm:$0xff] %vm782_vm3, %v697_v12  ;;  %787 = vst.msk [vmem:[#allocation2 + $0x20] sm:$0xff] %vm782_vm3, %v695_v16 }
 0x118   : > { %1108 = vrot.lane.b32.xlu1 %v3219_v59, %s2796_s4  ;;  %1076 = vrot.lane.b32.xlu0 %v3169_v21, %s2796_s4 }
 0x11a   : > { %v701_v46 = vpop.permute.xlu1 %700  ;;  %v699_v63 = vpop.permute.xlu0 %698 }
 0x11b   : > { %790 = vst.msk [vmem:[#allocation2 + $0x38] sm:$0xff] %vm782_vm3, %v701_v46  ;;  %789 = vst.msk [vmem:[#allocation2 + $0x30] sm:$0xff] %vm782_vm3, %v699_v63  ;;  %v2463_v63 = vld [vmem:[%s2877_s27 + $0x139] sm:$0xff] }
 0x11c   : > { %1686 = vrot.lane.b32.xlu1 %v3216_v58, %s2799_s18  ;;  %1654 = vrot.lane.b32.xlu0 %v3166_v18, %s2799_s18 }
 0x11e   : > { %v705_v3 = vpop.permute.xlu1 %704  ;;  %v703_v29 = vpop.permute.xlu0 %702 }
 0x11f   : > { %792 = vst.msk [vmem:[#allocation2 + $0x48] sm:$0xff] %vm782_vm3, %v705_v3  ;;  %791 = vst.msk [vmem:[#allocation2 + $0x40] sm:$0xff] %vm782_vm3, %v703_v29  ;;  %v2448_v29 = vld [vmem:[%s2877_s27 + $0x81] sm:$0xff] }
 0x120   : > { %1110 = vrot.lane.b32.xlu1 %v3216_v58, %s2796_s4  ;;  %1078 = vrot.lane.b32.xlu0 %v3166_v18, %s2796_s4 }
 0x122   : > { %v709_v21 = vpop.permute.xlu1 %708  ;;  %v707_v59 = vpop.permute.xlu0 %706 }
 0x123   : > { %794 = vst.msk [vmem:[#allocation2 + $0x58] sm:$0xff] %vm782_vm3, %v709_v21  ;;  %793 = vst.msk [vmem:[#allocation2 + $0x50] sm:$0xff] %vm782_vm3, %v707_v59  ;;  %v2464_v59 = vld [vmem:[%s2877_s27 + $0x141] sm:$0xff] }
 0x124   : > { %1302 = vrot.lane.b32.xlu1 %v3055_v41, %s2797_s5  ;;  %1270 = vrot.lane.b32.xlu0 %v2975_v23, %s2797_s5  ;;  %v4034_v23 = vld [vmem:[#allocation7_spill] sm:$0xff] }
 0x126   : > { %v713_v60 = vpop.permute.xlu1 %712  ;;  %v711_v1 = vpop.permute.xlu0 %710 }
 0x127   : > { %796 = vst.msk [vmem:[#allocation2 + $0x68] sm:$0xff] %vm782_vm3, %v713_v60  ;;  %795 = vst.msk [vmem:[#allocation2 + $0x60] sm:$0xff] %vm782_vm3, %v711_v1 }
 0x128   : > { %1304 = vrot.lane.b32.xlu1 %v3052_v40, %s2797_s5  ;;  %1272 = vrot.lane.b32.xlu0 %v2970_v22, %s2797_s5 }
 0x12a   : > { %v717_v18 = vpop.permute.xlu1 %716  ;;  %v715_v58 = vpop.permute.xlu0 %714 }
 0x12b   : > { %798 = vst.msk [vmem:[#allocation2 + $0x78] sm:$0xff] %vm782_vm3, %v717_v18  ;;  %797 = vst.msk [vmem:[#allocation2 + $0x70] sm:$0xff] %vm782_vm3, %v715_v58  ;;  %v2495_v18 = vld [vmem:[%s2877_s27 + $0x13a] sm:$0xff] }
 0x12c   : > { %1495 = vrot.lane.b32.xlu1 %v4034_v23, %s2798_s6  ;;  %1463 = vrot.lane.b32.xlu0 %v2907_v7, %s2798_s6  ;;  %v4035_v7 = vld [vmem:[#allocation9_spill] sm:$0xff] }
 0x12e   : > { %v721_v41 = vpop.permute.xlu1 %720  ;;  %v719_v50 = vpop.permute.xlu0 %718 }
 0x12f   : > { %800 = vst.msk [vmem:[#allocation2 + $0x88] sm:$0xff] %vm782_vm3, %v721_v41  ;;  %799 = vst.msk [vmem:[#allocation2 + $0x80] sm:$0xff] %vm782_vm3, %v719_v50 }
 0x130   : > { %1465 = vrot.lane.b32.xlu1 %v2904_v6, %s2798_s6  ;;  %919 = vrot.lane.b32.xlu0 %v4034_v23, %s2795_s3  ;;  %v4037_v6 = vld [vmem:[#allocation11_spill] sm:$0xff] }
 0x132   : > { %v725_v22 = vpop.permute.xlu1 %724  ;;  %v723_v40 = vpop.permute.xlu0 %722 }
 0x133   : > { %802 = vst.msk [vmem:[#allocation2 + $0x98] sm:$0xff] %vm782_vm3, %v725_v22  ;;  %801 = vst.msk [vmem:[#allocation2 + $0x90] sm:$0xff] %vm782_vm3, %v723_v40  ;;  %v2496_v22 = vld [vmem:[%s2877_s27 + $0x142] sm:$0xff] }
 0x134   : > { %1656 = vrot.lane.b32.xlu1 %v4035_v7, %s2799_s18  ;;  %1497 = vrot.lane.b32.xlu0 %v4036_v51, %s2798_s6  ;;  %v2480_v40 = vld [vmem:[%s2877_s27 + $0x82] sm:$0xff] }
 0x136   : > { %v729_v30 = vpop.permute.xlu1 %728  ;;  %v727_v56 = vpop.permute.xlu0 %726 }
 0x137   : > { %804 = vst.msk [vmem:[#allocation2 + $0xa8] sm:$0xff] %vm782_vm3, %v729_v30  ;;  %803 = vst.msk [vmem:[#allocation2 + $0xa0] sm:$0xff] %vm782_vm3, %v727_v56 }
 0x138   : > { %921 = vrot.lane.b32.xlu1 %v4036_v51, %s2795_s3  ;;  %1688 = vrot.lane.b32.xlu0 %v4037_v6, %s2799_s18 }
 0x13a   : > { %v733_v57 = vpop.permute.xlu1 %732  ;;  %v731_v28 = vpop.permute.xlu0 %730 }
 0x13b   : > { %806 = vst.msk [vmem:[#allocation2 + $0xb8] sm:$0xff] %vm782_vm3, %v733_v57  ;;  %805 = vst.msk [vmem:[#allocation2 + $0xb0] sm:$0xff] %vm782_vm3, %v731_v28  ;;  %v2417_v57 = vld [vmem:[%s2877_s27 + $0x90] sm:$0xff] }
 0x13c   : > { %1112 = vrot.lane.b32.xlu1 %v4037_v6, %s2796_s4  ;;  %1080 = vrot.lane.b32.xlu0 %v4035_v7, %s2796_s4 }
 0x13e   : > { %v737_v31 = vpop.permute.xlu1 %736  ;;  %v735_v0 = vpop.permute.xlu0 %734 }
 0x13f   : > { %808 = vst.msk [vmem:[#allocation2 + $0xc8] sm:$0xff] %vm782_vm3, %v737_v31  ;;  %807 = vst.msk [vmem:[#allocation2 + $0xc0] sm:$0xff] %vm782_vm3, %v735_v0 }
 0x140   : > { %1690 = vrot.lane.b32.xlu1 %v4038_v2, %s2799_s18  ;;  %1658 = vrot.lane.b32.xlu0 %v4039_v32, %s2799_s18 }
 0x142   : > { %v741_v33 = vpop.permute.xlu1 %740  ;;  %v739_v34 = vpop.permute.xlu0 %738 }
 0x143   : > { %810 = vst.msk [vmem:[#allocation2 + $0xd8] sm:$0xff] %vm782_vm3, %v741_v33  ;;  %809 = vst.msk [vmem:[#allocation2 + $0xd0] sm:$0xff] %vm782_vm3, %v739_v34  ;;  %v2465_v34 = vld [vmem:[%s2877_s27 + $0x151] sm:$0xff] }
 0x144   : > { %1114 = vrot.lane.b32.xlu1 %v4038_v2, %s2796_s4  ;;  %1082 = vrot.lane.b32.xlu0 %v4039_v32, %s2796_s4  ;;  %v2418_v2 = vld [vmem:[%s2877_s27 + $0x98] sm:$0xff] }
 0x146   : > { %v745_v35 = vpop.permute.xlu1 %744  ;;  %v743_v8 = vpop.permute.xlu0 %742 }
 0x147   : > { %812 = vst.msk [vmem:[#allocation2 + $0xe8] sm:$0xff] %vm782_vm3, %v745_v35  ;;  %811 = vst.msk [vmem:[#allocation2 + $0xe0] sm:$0xff] %vm782_vm3, %v743_v8  ;;  %v2449_v35 = vld [vmem:[%s2877_s27 + $0x91] sm:$0xff] }
 0x148   : > { %1306 = vrot.lane.b32.xlu1 %v3075_v45, %s2797_s5  ;;  %1274 = vrot.lane.b32.xlu0 %v2981_v25, %s2797_s5  ;;  %v2445_v45 = vld [vmem:[%s2877_s27 + $0x61] sm:$0xff] }
 0x14a   : > { %v749_v9 = vpop.permute.xlu1 %748  ;;  %v747_v10 = vpop.permute.xlu0 %746 }
 0x14b   : > { %814 = vst.msk [vmem:[#allocation2 + $0xf8] sm:$0xff] %vm782_vm3, %v749_v9  ;;  %813 = vst.msk [vmem:[#allocation2 + $0xf0] sm:$0xff] %vm782_vm3, %v747_v10 }
 0x14c   : > { %1308 = vrot.lane.b32.xlu1 %v3072_v44, %s2797_s5  ;;  %1276 = vrot.lane.b32.xlu0 %v2978_v24, %s2797_s5  ;;  %v2477_v24 = vld [vmem:[%s2877_s27 + $0x62] sm:$0xff] }
 0x14e   : > { %v882_v14 = vpop.permute.xlu1 %881  ;;  %v880_v25 = vpop.permute.xlu0 %879 }
 0x14f   : > { %977 = vst.msk [vmem:[#allocation2 + $0x8] sm:$0xff] %vm975_vm5, %v882_v14  ;;  %976 = vst.msk [vmem:[#allocation2] sm:$0xff] %vm975_vm5, %v880_v25  ;;  %v2481_v14 = vld [vmem:[%s2877_s27 + $0x92] sm:$0xff] }
 0x150   : > { %1499 = vrot.lane.b32.xlu1 %v2461_v11, %s2798_s6  ;;  %1467 = vrot.lane.b32.xlu0 %v2445_v45, %s2798_s6  ;;  %v2466_v25 = vld [vmem:[%s2877_s27 + $0x159] sm:$0xff] }
 0x152   : > { %v886_v44 = vpop.permute.xlu1 %885  ;;  %v884_v42 = vpop.permute.xlu0 %883 }
 0x153   : > { %979 = vst.msk [vmem:[#allocation2 + $0x18] sm:$0xff] %vm975_vm5, %v886_v44  ;;  %978 = vst.msk [vmem:[#allocation2 + $0x10] sm:$0xff] %vm975_vm5, %v884_v42  ;;  %v2497_v42 = vld [vmem:[%s2877_s27 + $0x152] sm:$0xff] }
 0x154   : > { %1469 = vrot.lane.b32.xlu1 %v2446_v15, %s2798_s6  ;;  %923 = vrot.lane.b32.xlu0 %v2461_v11, %s2795_s3 }
 0x156   : > { %v890_v17 = vpop.permute.xlu1 %889  ;;  %v888_v55 = vpop.permute.xlu0 %887 }
 0x157   : > { %981 = vst.msk [vmem:[#allocation2 + $0x28] sm:$0xff] %vm975_vm5, %v890_v17  ;;  %980 = vst.msk [vmem:[#allocation2 + $0x20] sm:$0xff] %vm975_vm5, %v888_v55 }
 0x158   : > { %1660 = vrot.lane.b32.xlu1 %v2477_v24, %s2799_s18  ;;  %1501 = vrot.lane.b32.xlu0 %v2462_v43, %s2798_s6 }
 0x15a   : > { %v894_v13 = vpop.permute.xlu1 %893  ;;  %v892_v54 = vpop.permute.xlu0 %891 }
 0x15b   : > { %983 = vst.msk [vmem:[#allocation2 + $0x38] sm:$0xff] %vm975_vm5, %v894_v13  ;;  %982 = vst.msk [vmem:[#allocation2 + $0x30] sm:$0xff] %vm975_vm5, %v892_v54  ;;  %v2498_v13 = vld [vmem:[%s2877_s27 + $0x15a] sm:$0xff] }
 0x15c   : > { %925 = vrot.lane.b32.xlu1 %v2462_v43, %s2795_s3  ;;  %1692 = vrot.lane.b32.xlu0 %v4040_v20, %s2799_s18  ;;  %v2482_v54 = vld [vmem:[%s2877_s27 + $0x9a] sm:$0xff] }
 0x15e   : > { %v898_v39 = vpop.permute.xlu1 %897  ;;  %v896_v19 = vpop.permute.xlu0 %895 }
 0x15f   : > { %985 = vst.msk [vmem:[#allocation2 + $0x48] sm:$0xff] %vm975_vm5, %v898_v39  ;;  %984 = vst.msk [vmem:[#allocation2 + $0x40] sm:$0xff] %vm975_vm5, %v896_v19 }
 0x160   : > { %1116 = vrot.lane.b32.xlu1 %v4040_v20, %s2796_s4  ;;  %1084 = vrot.lane.b32.xlu0 %v2477_v24, %s2796_s4 }
 0x162   : > { %v902_v38 = vpop.permute.xlu1 %901  ;;  %v900_v36 = vpop.permute.xlu0 %899 }
 0x163   : > { %987 = vst.msk [vmem:[#allocation2 + $0x58] sm:$0xff] %vm975_vm5, %v902_v38  ;;  %986 = vst.msk [vmem:[#allocation2 + $0x50] sm:$0xff] %vm975_vm5, %v900_v36  ;;  %v2435_v36 = vld [vmem:[%s2877_s27 + $0x168] sm:$0xff] }
 0x164   : > { %1694 = vrot.lane.b32.xlu1 %v4041_v4, %s2799_s18  ;;  %1662 = vrot.lane.b32.xlu0 %v2478_v5, %s2799_s18  ;;  %v2419_v4 = vld [vmem:[%s2877_s27 + $0xa8] sm:$0xff] }
 0x166   : > { %v914_v37 = vpop.permute.xlu1 %913  ;;  %v912_v61 = vpop.permute.xlu0 %911 }
 0x167   : > { %993 = vst.msk [vmem:[#allocation2 + $0x88] sm:$0xff] %vm975_vm5, %v914_v37  ;;  %992 = vst.msk [vmem:[#allocation2 + $0x80] sm:$0xff] %vm975_vm5, %v912_v61 }
 0x168   : > { %1118 = vrot.lane.b32.xlu1 %v2400_v47, %s2796_s4  ;;  %1086 = vrot.lane.b32.xlu0 %v2478_v5, %s2796_s4 }
 0x16a   : > { %v1105_v62 = vpop.permute.xlu1 %1104  ;;  %v1073_v12 = vpop.permute.xlu0 %1072 }
 0x16b   : > { %1185 = vst.msk [vmem:[#allocation2 + $0x80] sm:$0xff] %vm1168_vm6, %v1105_v62  ;;  %1169 = vst.msk [vmem:[#allocation2] sm:$0xff] %vm1168_vm6, %v1073_v12  ;;  %v2436_v62 = vld [vmem:[%s2877_s27 + $0x170] sm:$0xff] }
 0x16c   : > { %1310 = vrot.lane.b32.xlu1 %v3095_v49, %s2797_s5  ;;  %1278 = vrot.lane.b32.xlu0 %v2993_v27, %s2797_s5  ;;  %v2447_v49 = vld [vmem:[%s2877_s27 + $0x79] sm:$0xff]  ;;  %v2420_v12 = vld [vmem:[%s2877_s27 + $0xb0] sm:$0xff] }
 0x16e   : > { %v1107_v16 = vpop.permute.xlu1 %1106  ;;  %v1075_v46 = vpop.permute.xlu0 %1074 }
 0x16f   : > { %1186 = vst.msk [vmem:[#allocation2 + $0x88] sm:$0xff] %vm1168_vm6, %v1107_v16  ;;  %1170 = vst.msk [vmem:[#allocation2 + $0x8] sm:$0xff] %vm1168_vm6, %v1075_v46 }
 0x170   : > { %1312 = vrot.lane.b32.xlu1 %v3092_v48, %s2797_s5  ;;  %1280 = vrot.lane.b32.xlu0 %v2990_v26, %s2797_s5  ;;  %v2479_v26 = vld [vmem:[%s2877_s27 + $0x7a] sm:$0xff] }
 0x172   : > { %v1299_v3 = vpop.permute.xlu1 %1298  ;;  %v1267_v27 = vpop.permute.xlu0 %1266 }
 0x173   : > { %1379 = vst.msk [vmem:[#allocation2 + $0x80] sm:$0xff] %vm1362_vm7, %v1299_v3  ;;  %1363 = vst.msk [vmem:[#allocation2] sm:$0xff] %vm1362_vm7, %v1267_v27 }
 0x174   : > { %1503 = vrot.lane.b32.xlu1 %v2463_v63, %s2798_s6  ;;  %1471 = vrot.lane.b32.xlu0 %v2447_v49, %s2798_s6  ;;  %v2451_v49 = vld [vmem:[%s2877_s27 + $0xa9] sm:$0xff] }
 0x176   : > { %v1301_v48 = vpop.permute.xlu1 %1300  ;;  %v1269_v21 = vpop.permute.xlu0 %1268 }
 0x177   : > { %1380 = vst.msk [vmem:[#allocation2 + $0x88] sm:$0xff] %vm1362_vm7, %v1301_v48  ;;  %1364 = vst.msk [vmem:[#allocation2 + $0x8] sm:$0xff] %vm1362_vm7, %v1269_v21 }
 0x178   : > { %1473 = vrot.lane.b32.xlu1 %v2448_v29, %s2798_s6  ;;  %927 = vrot.lane.b32.xlu0 %v2463_v63, %s2795_s3  ;;  %v2467_v63 = vld [vmem:[%s2877_s27 + $0x169] sm:$0xff] }
 0x17a   : > { %v1492_v60 = vpop.permute.xlu1 %1491  ;;  %v1460_v1 = vpop.permute.xlu0 %1459 }
 0x17b   : > { %1572 = vst.msk [vmem:[#allocation2 + $0x80] sm:$0xff] %vm1555_vm8, %v1492_v60  ;;  %1556 = vst.msk [vmem:[#allocation2] sm:$0xff] %vm1555_vm8, %v1460_v1  ;;  %v2452_v60 = vld [vmem:[%s2877_s27 + $0xb1] sm:$0xff] }
 0x17c   : > { %1664 = vrot.lane.b32.xlu1 %v2479_v26, %s2799_s18  ;;  %1505 = vrot.lane.b32.xlu0 %v2464_v59, %s2798_s6 }
 0x17e   : > { %v1462_v58 = vpop.permute.xlu1 %1461  ;;  %v916_v23 = vpop.permute.xlu0 %915 }
 0x17f   : > { %1557 = vst.msk [vmem:[#allocation2 + $0x8] sm:$0xff] %vm1555_vm8, %v1462_v58  ;;  %v2499_v58 = vld [vmem:[%s2877_s27 + $0x16a] sm:$0xff] }
 0x180   : > { %994 = vst.msk [vmem:[#allocation2 + $0x90] sm:$0xff] %vm975_vm5, %v916_v23  ;;  %929 = vrot.lane.b32.xlu1 %v2464_v59, %s2795_s3  ;;  %1696 = vrot.lane.b32.xlu0 %v2495_v18, %s2799_s18  ;;  %v2468_v59 = vld [vmem:[%s2877_s27 + $0x171] sm:$0xff] }
 0x181   : > { %v2483_v23 = vld [vmem:[%s2877_s27 + $0xaa] sm:$0xff] }
 0x182   : > { %v1653_v41 = vpop.permute.xlu1 %1652  ;;  %v1494_v50 = vpop.permute.xlu0 %1493 }
 0x183   : > { %1749 = vst.msk [vmem:[#allocation2] sm:$0xff] %vm1748_vm9, %v1653_v41 }
 0x184   : > { %1573 = vst.msk [vmem:[#allocation2 + $0x88] sm:$0xff] %vm1555_vm8, %v1494_v50  ;;  %1120 = vrot.lane.b32.xlu1 %v2495_v18, %s2796_s4  ;;  %1088 = vrot.lane.b32.xlu0 %v2479_v26, %s2796_s4 }
 0x186   : > { %v918_v7 = vpop.permute.xlu1 %917  ;;  %v1685_v51 = vpop.permute.xlu0 %1684 }
 0x187   : > { %995 = vst.msk [vmem:[#allocation2 + $0x98] sm:$0xff] %vm975_vm5, %v918_v7 }
 0x188   : > { %1765 = vst.msk [vmem:[#allocation2 + $0x80] sm:$0xff] %vm1748_vm9, %v1685_v51  ;;  %1698 = vrot.lane.b32.xlu1 %v2496_v22, %s2799_s18  ;;  %1666 = vrot.lane.b32.xlu0 %v2480_v40, %s2799_s18 }
 0x18a   : > { %v1109_v30 = vpop.permute.xlu1 %1108  ;;  %v1077_v56 = vpop.permute.xlu0 %1076  ;;  %v1781_v6 = vld [vmem:[#allocation2] sm:$0xff] }
 0x18b   : > { %1187 = vst.msk [vmem:[#allocation2 + $0x90] sm:$0xff] %vm1168_vm6, %v1109_v30  ;;  %1171 = vst.msk [vmem:[#allocation2 + $0x10] sm:$0xff] %vm1168_vm6, %v1077_v56  ;;  %2591 = vmatprep.mubr.msk.f32.mxu0 %vm1818_vm10, %v1781_v6  ;;  %v2500_v30 = vld [vmem:[%s2877_s27 + $0x172] sm:$0xff] }
 0x18c   : > { %1122 = vrot.lane.b32.xlu1 %v2496_v22, %s2796_s4  ;;  %1090 = vrot.lane.b32.xlu0 %v2480_v40, %s2796_s4  ;;  %v2484_v56 = vld [vmem:[%s2877_s27 + $0xb2] sm:$0xff] }
 0x18e   : > { %v1687_v28 = vpop.permute.xlu1 %1686  ;;  %v1655_v31 = vpop.permute.xlu0 %1654 }
 0x18f   : > { %v1797_v0 = vld [vmem:[#allocation2 + $0x80] sm:$0xff]  ;;  %1766 = vst.msk [vmem:[#allocation2 + $0x88] sm:$0xff] %vm1748_vm9, %v1687_v28  ;;  %1750 = vst.msk [vmem:[#allocation2 + $0x8] sm:$0xff] %vm1748_vm9, %v1655_v31 }
 0x190   : > { %2615 = vmatprep.mubr.msk.f32.mxu1 %vm1818_vm10, %v1797_v0  ;;  %1314 = vrot.lane.b32.xlu1 %v3115_v53, %s2797_s5 }
 0x191   : > { %1282 = vrot.lane.b32.xlu0 %v2417_v57, %s2797_s5 }
 0x192   : > { %v1111_v32 = vpop.permute.xlu1 %1110  ;;  %v1079_v33 = vpop.permute.xlu0 %1078 }
 0x193   : > { %1188 = vst.msk [vmem:[#allocation2 + $0x98] sm:$0xff] %vm1168_vm6, %v1111_v32  ;;  %1172 = vst.msk [vmem:[#allocation2 + $0x18] sm:$0xff] %vm1168_vm6, %v1079_v33  ;;  %v2437_v32 = vld [vmem:[%s2877_s27 + $0x180] sm:$0xff] }
 0x194   : > { %1316 = vrot.lane.b32.xlu1 %v3112_v52, %s2797_s5  ;;  %v2450_v52 = vld [vmem:[%s2877_s27 + $0x99] sm:$0xff] }
 0x195   : > { %1284 = vrot.lane.b32.xlu0 %v2418_v2, %s2797_s5  ;;  %v2421_v33 = vld [vmem:[%s2877_s27 + $0xc0] sm:$0xff] }
 0x196   : > { %v1303_v8 = vpop.permute.xlu1 %1302  ;;  %v1271_v9 = vpop.permute.xlu0 %1270  ;;  %v1782_v53 = vld [vmem:[#allocation2 + $0x8] sm:$0xff] }
 0x197   : > { %v1798_v10 = vld [vmem:[#allocation2 + $0x88] sm:$0xff]  ;;  %1381 = vst.msk [vmem:[#allocation2 + $0x90] sm:$0xff] %vm1362_vm7, %v1303_v8  ;;  %1365 = vst.msk [vmem:[#allocation2 + $0x10] sm:$0xff] %vm1362_vm7, %v1271_v9  ;;  %2592 = vmatmul.mubr.msk.f32.vlgmr.msra.gmra.mxu0 %vm1818_vm10, %v1782_v53 }
 0x198   : > { %2616 = vmatmul.mubr.msk.f32.vlgmr.msra.gmra.mxu1 %vm1818_vm10, %v1798_v10  ;;  %1507 = vrot.lane.b32.xlu1 %v2465_v34, %s2798_s6  ;;  %v2438_v8 = vld [vmem:[%s2877_s27 + $0x188] sm:$0xff] }
 0x199   : > { %1475 = vrot.lane.b32.xlu0 %v2449_v35, %s2798_s6  ;;  %v2422_v9 = vld [vmem:[%s2877_s27 + $0xc8] sm:$0xff] }
 0x19a   : > { %v1305_v11 = vpop.permute.xlu1 %1304  ;;  %v1273_v45 = vpop.permute.xlu0 %1272 }
 0x19b   : > { %1382 = vst.msk [vmem:[#allocation2 + $0x98] sm:$0xff] %vm1362_vm7, %v1305_v11  ;;  %1366 = vst.msk [vmem:[#allocation2 + $0x18] sm:$0xff] %vm1362_vm7, %v1273_v45  ;;  %v2469_v45 = vld [vmem:[%s2877_s27 + $0x181] sm:$0xff] }
 0x19c   : > { %1477 = vrot.lane.b32.xlu1 %v2450_v52, %s2798_s6 }
 0x19d   : > { %931 = vrot.lane.b32.xlu0 %v2465_v34, %s2795_s3 }
 0x19e   : > { %v1496_v15 = vpop.permute.xlu1 %1495  ;;  %v1464_v44 = vpop.permute.xlu0 %1463 }
 0x19f   : > { %1574 = vst.msk [vmem:[#allocation2 + $0x90] sm:$0xff] %vm1555_vm8, %v1496_v15  ;;  %1558 = vst.msk [vmem:[#allocation2 + $0x10] sm:$0xff] %vm1555_vm8, %v1464_v44 }
 0x1a0   : > { %1668 = vrot.lane.b32.xlu1 %v2481_v14, %s2799_s18 }
 0x1a1   : > { %1509 = vrot.lane.b32.xlu0 %v2466_v25, %s2798_s6 }
 0x1a2   : > { %v1466_v24 = vpop.permute.xlu1 %1465  ;;  %v920_v43 = vpop.permute.xlu0 %919 }
 0x1a3   : > { %1559 = vst.msk [vmem:[#allocation2 + $0x18] sm:$0xff] %vm1555_vm8, %v1466_v24  ;;  %v2470_v24 = vld [vmem:[%s2877_s27 + $0x189] sm:$0xff] }
 0x1a4   : > { %996 = vst.msk [vmem:[#allocation2 + $0xa0] sm:$0xff] %vm975_vm5, %v920_v43  ;;  %933 = vrot.lane.b32.xlu1 %v2466_v25, %s2795_s3  ;;  %v2454_v43 = vld [vmem:[%s2877_s27 + $0xc9] sm:$0xff] }
 0x1a5   : > { %1700 = vrot.lane.b32.xlu0 %v2497_v42, %s2799_s18 }
 0x1a6   : > { %v1657_v17 = vpop.permute.xlu1 %1656  ;;  %v1498_v55 = vpop.permute.xlu0 %1497 }
 0x1a7   : > { %1751 = vst.msk [vmem:[#allocation2 + $0x10] sm:$0xff] %vm1748_vm9, %v1657_v17 }
 0x1a8   : > { %1575 = vst.msk [vmem:[#allocation2 + $0x98] sm:$0xff] %vm1555_vm8, %v1498_v55  ;;  %1124 = vrot.lane.b32.xlu1 %v2497_v42, %s2796_s4 }
 0x1a9   : > { %1092 = vrot.lane.b32.xlu0 %v2481_v14, %s2796_s4  ;;  %v2453_v14 = vld [vmem:[%s2877_s27 + $0xc1] sm:$0xff] }
 0x1aa   : > { %v922_v20 = vpop.permute.xlu1 %921  ;;  %v1689_v39 = vpop.permute.xlu0 %1688 }
 0x1ab   : > { %997 = vst.msk [vmem:[#allocation2 + $0xa8] sm:$0xff] %vm975_vm5, %v922_v20 }
 0x1ac   : > { %1767 = vst.msk [vmem:[#allocation2 + $0x90] sm:$0xff] %vm1748_vm9, %v1689_v39  ;;  %1702 = vrot.lane.b32.xlu1 %v2498_v13, %s2799_s18 }
 0x1ad   : > { %1670 = vrot.lane.b32.xlu0 %v2482_v54, %s2799_s18 }
 0x1ae   : > { %v1113_v19 = vpop.permute.xlu1 %1112  ;;  %v1081_v5 = vpop.permute.xlu0 %1080  ;;  %v1783_v38 = vld [vmem:[#allocation2 + $0x10] sm:$0xff] }
 0x1af   : > { %1189 = vst.msk [vmem:[#allocation2 + $0xa0] sm:$0xff] %vm1168_vm6, %v1113_v19  ;;  %1173 = vst.msk [vmem:[#allocation2 + $0x20] sm:$0xff] %vm1168_vm6, %v1081_v5  ;;  %2594 = vmatprep.mubr.msk.f32.mxu0 %vm1818_vm10, %v1783_v38 }
 0x1b0   : > { %1126 = vrot.lane.b32.xlu1 %v2498_v13, %s2796_s4  ;;  %v2501_v13 = vld [vmem:[%s2877_s27 + $0x182] sm:$0xff] }
 0x1b1   : > { %1094 = vrot.lane.b32.xlu0 %v2482_v54, %s2796_s4  ;;  %v2485_v54 = vld [vmem:[%s2877_s27 + $0xc2] sm:$0xff] }
 0x1b2   : > { %v1691_v47 = vpop.permute.xlu1 %1690  ;;  %v1659_v37 = vpop.permute.xlu0 %1658 }
 0x1b3   : > { %v1799_v61 = vld [vmem:[#allocation2 + $0x90] sm:$0xff]  ;;  %1768 = vst.msk [vmem:[#allocation2 + $0x98] sm:$0xff] %vm1748_vm9, %v1691_v47  ;;  %1752 = vst.msk [vmem:[#allocation2 + $0x18] sm:$0xff] %vm1748_vm9, %v1659_v37 }
 0x1b4   : > { %2618 = vmatprep.mubr.msk.f32.mxu1 %vm1818_vm10, %v1799_v61  ;;  %1318 = vrot.lane.b32.xlu1 %v2435_v36, %s2797_s5  ;;  %v2502_v47 = vld [vmem:[%s2877_s27 + $0x18a] sm:$0xff] }
 0x1b5   : > { %1286 = vrot.lane.b32.xlu0 %v2419_v4, %s2797_s5  ;;  %v2486_v37 = vld [vmem:[%s2877_s27 + $0xca] sm:$0xff] }
 0x1b6   : > { %v1115_v16 = vpop.permute.xlu1 %1114  ;;  %v1083_v46 = vpop.permute.xlu0 %1082 }
 0x1b7   : > { %1190 = vst.msk [vmem:[#allocation2 + $0xa8] sm:$0xff] %vm1168_vm6, %v1115_v16  ;;  %1174 = vst.msk [vmem:[#allocation2 + $0x28] sm:$0xff] %vm1168_vm6, %v1083_v46 }
 0x1b8   : > { %1320 = vrot.lane.b32.xlu1 %v2436_v62, %s2797_s5 }
 0x1b9   : > { %1288 = vrot.lane.b32.xlu0 %v2420_v12, %s2797_s5 }
 0x1ba   : > { %v1307_v3 = vpop.permute.xlu1 %1306  ;;  %v1275_v27 = vpop.permute.xlu0 %1274  ;;  %v1784_v29 = vld [vmem:[#allocation2 + $0x18] sm:$0xff] }
 0x1bb   : > { %v1800_v48 = vld [vmem:[#allocation2 + $0x98] sm:$0xff]  ;;  %1383 = vst.msk [vmem:[#allocation2 + $0xa0] sm:$0xff] %vm1362_vm7, %v1307_v3  ;;  %1367 = vst.msk [vmem:[#allocation2 + $0x20] sm:$0xff] %vm1362_vm7, %v1275_v27  ;;  %2595 = vmatmul.mubr.msk.f32.gmra.mxu0 %vm1818_vm10, %v1784_v29 }
 0x1bc   : > { %2619 = vmatmul.mubr.msk.f32.gmra.mxu1 %vm1818_vm10, %v1800_v48  ;;  %1511 = vrot.lane.b32.xlu1 %v2467_v63, %s2798_s6 }
 0x1bd   : > { %1479 = vrot.lane.b32.xlu0 %v2451_v49, %s2798_s6 }
 0x1be   : > { %v1309_v21 = vpop.permute.xlu1 %1308  ;;  %v1277_v26 = vpop.permute.xlu0 %1276 }
 0x1bf   : > { %1384 = vst.msk [vmem:[#allocation2 + $0xa8] sm:$0xff] %vm1362_vm7, %v1309_v21  ;;  %1368 = vst.msk [vmem:[#allocation2 + $0x28] sm:$0xff] %vm1362_vm7, %v1277_v26  ;;  %v2440_v21 = vld [vmem:[%s2877_s27 + $0x1a0] sm:$0xff] }
 0x1c0   : > { %935 = vrot.lane.b32.xlu1 %v2467_v63, %s2795_s3  ;;  %v2439_v63 = vld [vmem:[%s2877_s27 + $0x198] sm:$0xff]  ;;  %v2424_v26 = vld [vmem:[%s2877_s27 + $0xe0] sm:$0xff] }
 0x1c1   : > { %903 = vrot.lane.b32.xlu0 %v2451_v49, %s2795_s3  ;;  %v2423_v49 = vld [vmem:[%s2877_s27 + $0xd8] sm:$0xff] }
 0x1c2   : > { %v1500_v1 = vpop.permute.xlu1 %1499  ;;  %v1468_v18 = vpop.permute.xlu0 %1467 }
 0x1c3   : > { %1576 = vst.msk [vmem:[#allocation2 + $0xa0] sm:$0xff] %vm1555_vm8, %v1500_v1  ;;  %1560 = vst.msk [vmem:[#allocation2 + $0x20] sm:$0xff] %vm1555_vm8, %v1468_v18  ;;  %v2471_v1 = vld [vmem:[%s2877_s27 + $0x199] sm:$0xff] }
 0x1c4   : > { %1513 = vrot.lane.b32.xlu1 %v2468_v59, %s2798_s6  ;;  %v2455_v18 = vld [vmem:[%s2877_s27 + $0xd9] sm:$0xff] }
 0x1c5   : > { %1481 = vrot.lane.b32.xlu0 %v2452_v60, %s2798_s6 }
 0x1c6   : > { %v1470_v41 = vpop.permute.xlu1 %1469  ;;  %v924_v50 = vpop.permute.xlu0 %923 }
 0x1c7   : > { %1561 = vst.msk [vmem:[#allocation2 + $0x28] sm:$0xff] %vm1555_vm8, %v1470_v41  ;;  %v2472_v41 = vld [vmem:[%s2877_s27 + $0x1a1] sm:$0xff] }
 0x1c8   : > { %998 = vst.msk [vmem:[#allocation2 + $0xb0] sm:$0xff] %vm975_vm5, %v924_v50  ;;  %1704 = vrot.lane.b32.xlu1 %v2499_v58, %s2799_s18  ;;  %v2456_v50 = vld [vmem:[%s2877_s27 + $0xe1] sm:$0xff] }
 0x1c9   : > { %1672 = vrot.lane.b32.xlu0 %v2483_v23, %s2799_s18 }
 0x1ca   : > { %v1661_v22 = vpop.permute.xlu1 %1660  ;;  %v1502_v40 = vpop.permute.xlu0 %1501 }
 0x1cb   : > { %1753 = vst.msk [vmem:[#allocation2 + $0x20] sm:$0xff] %vm1748_vm9, %v1661_v22 }
 0x1cc   : > { %1577 = vst.msk [vmem:[#allocation2 + $0xa8] sm:$0xff] %vm1555_vm8, %v1502_v40  ;;  %937 = vrot.lane.b32.xlu1 %v2468_v59, %s2795_s3 }
 0x1cd   : > { %905 = vrot.lane.b32.xlu0 %v2452_v60, %s2795_s3 }
 0x1ce   : > { %v926_v7 = vpop.permute.xlu1 %925  ;;  %v1693_v51 = vpop.permute.xlu0 %1692 }
 0x1cf   : > { %999 = vst.msk [vmem:[#allocation2 + $0xb8] sm:$0xff] %vm975_vm5, %v926_v7  ;;  %v2503_v7 = vld [vmem:[%s2877_s27 + $0x19a] sm:$0xff] }
 0x1d0   : > { %1769 = vst.msk [vmem:[#allocation2 + $0xa0] sm:$0xff] %vm1748_vm9, %v1693_v51  ;;  %1128 = vrot.lane.b32.xlu1 %v2499_v58, %s2796_s4  ;;  %v2487_v51 = vld [vmem:[%s2877_s27 + $0xda] sm:$0xff] }
 0x1d1   : > { %1096 = vrot.lane.b32.xlu0 %v2483_v23, %s2796_s4 }
 0x1d2   : > { %v1117_v6 = vpop.permute.xlu1 %1116  ;;  %v1085_v57 = vpop.permute.xlu0 %1084  ;;  %v1785_v28 = vld [vmem:[#allocation2 + $0x20] sm:$0xff] }
 0x1d3   : > { %1191 = vst.msk [vmem:[#allocation2 + $0xb0] sm:$0xff] %vm1168_vm6, %v1117_v6  ;;  %1175 = vst.msk [vmem:[#allocation2 + $0x30] sm:$0xff] %vm1168_vm6, %v1085_v57  ;;  %2597 = vmatprep.mubr.msk.f32.mxu0 %vm1818_vm10, %v1785_v28  ;;  %v2504_v6 = vld [vmem:[%s2877_s27 + $0x1a2] sm:$0xff] }
 0x1d4   : > { %1706 = vrot.lane.b32.xlu1 %v2500_v30, %s2799_s18  ;;  %v2488_v57 = vld [vmem:[%s2877_s27 + $0xe2] sm:$0xff]  ;;  %s158_s27 = sand.u32 1, %s2774_s10  }
 0x1d5   : > { %1674 = vrot.lane.b32.xlu0 %v2484_v56, %s2799_s18  ;;  %s2311_s30 = sshll.u32 %s158_s27, 8 }
 0x1d6   : > { %v1695_v31 = vpop.permute.xlu1 %1694  ;;  %v1663_v0 = vpop.permute.xlu0 %1662 }
 0x1d7   : > { %v1801_v2 = vld [vmem:[#allocation2 + $0xa0] sm:$0xff]  ;;  %1770 = vst.msk [vmem:[#allocation2 + $0xa8] sm:$0xff] %vm1748_vm9, %v1695_v31  ;;  %1754 = vst.msk [vmem:[#allocation2 + $0x28] sm:$0xff] %vm1748_vm9, %v1663_v0 }
 0x1d8   : > { %2621 = vmatprep.mubr.msk.f32.mxu1 %vm1818_vm10, %v1801_v2  ;;  %1130 = vrot.lane.b32.xlu1 %v2500_v30, %s2796_s4 }
 0x1d9   : > { %1098 = vrot.lane.b32.xlu0 %v2484_v56, %s2796_s4 }
 0x1da   : > { %v1119_v34 = vpop.permute.xlu1 %1118  ;;  %v1087_v35 = vpop.permute.xlu0 %1086 }
 0x1db   : > { %1192 = vst.msk [vmem:[#allocation2 + $0xb8] sm:$0xff] %vm1168_vm6, %v1119_v34  ;;  %1176 = vst.msk [vmem:[#allocation2 + $0x38] sm:$0xff] %vm1168_vm6, %v1087_v35 }
 0x1dc   : > { %1322 = vrot.lane.b32.xlu1 %v2437_v32, %s2797_s5 }
 0x1dd   : > { %1290 = vrot.lane.b32.xlu0 %v2421_v33, %s2797_s5 }
 0x1de   : > { %v1311_v53 = vpop.permute.xlu1 %1310  ;;  %v1279_v10 = vpop.permute.xlu0 %1278  ;;  %v1786_v52 = vld [vmem:[#allocation2 + $0x28] sm:$0xff] }
 0x1df   : > { %v1802_v11 = vld [vmem:[#allocation2 + $0xa8] sm:$0xff]  ;;  %1385 = vst.msk [vmem:[#allocation2 + $0xb0] sm:$0xff] %vm1362_vm7, %v1311_v53  ;;  %1369 = vst.msk [vmem:[#allocation2 + $0x30] sm:$0xff] %vm1362_vm7, %v1279_v10  ;;  %2598 = vmatmul.mubr.msk.f32.gmra.mxu0 %vm1818_vm10, %v1786_v52 }
 0x1e0   : > { %2622 = vmatmul.mubr.msk.f32.gmra.mxu1 %vm1818_vm10, %v1802_v11  ;;  %1324 = vrot.lane.b32.xlu1 %v2438_v8, %s2797_s5 }
 0x1e1   : > { %1292 = vrot.lane.b32.xlu0 %v2422_v9, %s2797_s5 }
 0x1e2   : > { %v1313_v25 = vpop.permute.xlu1 %1312  ;;  %v1281_v15 = vpop.permute.xlu0 %1280 }
 0x1e3   : > { %1386 = vst.msk [vmem:[#allocation2 + $0xb8] sm:$0xff] %vm1362_vm7, %v1313_v25  ;;  %1370 = vst.msk [vmem:[#allocation2 + $0x38] sm:$0xff] %vm1362_vm7, %v1281_v15 }
 0x1e4   : > { %1515 = vrot.lane.b32.xlu1 %v2469_v45, %s2798_s6 }
 0x1e5   : > { %1483 = vrot.lane.b32.xlu0 %v2453_v14, %s2798_s6 }
 0x1e6   : > { %v1504_v44 = vpop.permute.xlu1 %1503  ;;  %v1472_v42 = vpop.permute.xlu0 %1471 }
 0x1e7   : > { %1578 = vst.msk [vmem:[#allocation2 + $0xb0] sm:$0xff] %vm1555_vm8, %v1504_v44  ;;  %1562 = vst.msk [vmem:[#allocation2 + $0x30] sm:$0xff] %vm1555_vm8, %v1472_v42 }
 0x1e8   : > { %939 = vrot.lane.b32.xlu1 %v2469_v45, %s2795_s3 }
 0x1e9   : > { %907 = vrot.lane.b32.xlu0 %v2453_v14, %s2795_s3 }
 0x1ea   : > { %v1474_v17 = vpop.permute.xlu1 %1473  ;;  %v928_v55 = vpop.permute.xlu0 %927 }
 0x1eb   : > { %1563 = vst.msk [vmem:[#allocation2 + $0x38] sm:$0xff] %vm1555_vm8, %v1474_v17 }
 0x1ec   : > { %1000 = vst.msk [vmem:[#allocation2 + $0xc0] sm:$0xff] %vm975_vm5, %v928_v55  ;;  %1517 = vrot.lane.b32.xlu1 %v2470_v24, %s2798_s6 }
 0x1ed   : > { %1485 = vrot.lane.b32.xlu0 %v2454_v43, %s2798_s6 }
 0x1ee   : > { %v1665_v20 = vpop.permute.xlu1 %1664  ;;  %v1506_v39 = vpop.permute.xlu0 %1505 }
 0x1ef   : > { %1755 = vst.msk [vmem:[#allocation2 + $0x30] sm:$0xff] %vm1748_vm9, %v1665_v20 }
 0x1f0   : > { %1579 = vst.msk [vmem:[#allocation2 + $0xb8] sm:$0xff] %vm1555_vm8, %v1506_v39  ;;  %1708 = vrot.lane.b32.xlu1 %v2501_v13, %s2799_s18 }
 0x1f1   : > { %1676 = vrot.lane.b32.xlu0 %v2485_v54, %s2799_s18 }
 0x1f2   : > { %v930_v19 = vpop.permute.xlu1 %929  ;;  %v1697_v5 = vpop.permute.xlu0 %1696 }
 0x1f3   : > { %1001 = vst.msk [vmem:[#allocation2 + $0xc8] sm:$0xff] %vm975_vm5, %v930_v19 }
 0x1f4   : > { %1771 = vst.msk [vmem:[#allocation2 + $0xb0] sm:$0xff] %vm1748_vm9, %v1697_v5  ;;  %941 = vrot.lane.b32.xlu1 %v2470_v24, %s2795_s3 }
 0x1f5   : > { %909 = vrot.lane.b32.xlu0 %v2454_v43, %s2795_s3  ;;  %s3881_s3 = scalar_lea.vmem [#allocation3], %s2311_s30 }
 0x1f6   : > { %v1121_v38 = vpop.permute.xlu1 %1120  ;;  %v1089_v36 = vpop.permute.xlu0 %1088  ;;  %v1787_v4 = vld [vmem:[#allocation2 + $0x30] sm:$0xff] }
 0x1f7   : > { %1193 = vst.msk [vmem:[#allocation2 + $0xc0] sm:$0xff] %vm1168_vm6, %v1121_v38  ;;  %1177 = vst.msk [vmem:[#allocation2 + $0x40] sm:$0xff] %vm1168_vm6, %v1089_v36  ;;  %2600 = vmatprep.mubr.msk.f32.mxu0 %vm1818_vm10, %v1787_v4 }
 0x1f8   : > { %1132 = vrot.lane.b32.xlu1 %v2501_v13, %s2796_s4 }
 0x1f9   : > { %1100 = vrot.lane.b32.xlu0 %v2485_v54, %s2796_s4 }
 0x1fa   : > { %v1699_v61 = vpop.permute.xlu1 %1698  ;;  %v1667_v62 = vpop.permute.xlu0 %1666 }
 0x1fb   : > { %v1803_v12 = vld [vmem:[#allocation2 + $0xb0] sm:$0xff]  ;;  %1772 = vst.msk [vmem:[#allocation2 + $0xb8] sm:$0xff] %vm1748_vm9, %v1699_v61  ;;  %1756 = vst.msk [vmem:[#allocation2 + $0x38] sm:$0xff] %vm1748_vm9, %v1667_v62 }
 0x1fc   : > { %2624 = vmatprep.mubr.msk.f32.mxu1 %vm1818_vm10, %v1803_v12  ;;  %1710 = vrot.lane.b32.xlu1 %v2502_v47, %s2799_s18 }
 0x1fd   : > { %1678 = vrot.lane.b32.xlu0 %v2486_v37, %s2799_s18 }
 0x1fe   : > { %v1123_v16 = vpop.permute.xlu1 %1122  ;;  %v1091_v46 = vpop.permute.xlu0 %1090 }
 0x1ff   : > { %1194 = vst.msk [vmem:[#allocation2 + $0xc8] sm:$0xff] %vm1168_vm6, %v1123_v16  ;;  %1178 = vst.msk [vmem:[#allocation2 + $0x48] sm:$0xff] %vm1168_vm6, %v1091_v46 }
 0x200   : > { %1134 = vrot.lane.b32.xlu1 %v2502_v47, %s2796_s4 }
 0x201   : > { %1102 = vrot.lane.b32.xlu0 %v2486_v37, %s2796_s4  ;;  %s2543_s4 = sshll.u32 %s2782_s12, 12  ;;  %s3960_s12 = scalar_lea.sflag [#allocation4], %s158_s27 }
 0x202   : > { %v1315_v3 = vpop.permute.xlu1 %1314  ;;  %v1788_v29 = vld [vmem:[#allocation2 + $0x38] sm:$0xff]  ;;  %s3950_s8 = scalar_lea.hbm %s4008_s2, %s2543_s4 }
 0x203   : > { %v1283_v27 = vpop.permute.xlu0 %1282  ;;  %v1804_v48 = vld [vmem:[#allocation2 + $0xb8] sm:$0xff]  ;;  %1387 = vst.msk [vmem:[#allocation2 + $0xc0] sm:$0xff] %vm1362_vm7, %v1315_v3  ;;  %2601 = vmatmul.mubr.msk.f32.gmra.mxu0 %vm1818_vm10, %v1788_v29 }
 0x204   : > { %1371 = vst.msk [vmem:[#allocation2 + $0x40] sm:$0xff] %vm1362_vm7, %v1283_v27  ;;  %2625 = vmatmul.mubr.msk.f32.gmra.mxu1 %vm1818_vm10, %v1804_v48  ;;  %1326 = vrot.lane.b32.xlu1 %v2439_v63, %s2797_s5 }
 0x205   : > { %1294 = vrot.lane.b32.xlu0 %v2423_v49, %s2797_s5 }
 0x206   : > { %v1317_v59 = vpop.permute.xlu1 %1316 }
 0x207   : > { %v1285_v60 = vpop.permute.xlu0 %1284  ;;  %1388 = vst.msk [vmem:[#allocation2 + $0xc8] sm:$0xff] %vm1362_vm7, %v1317_v59 }
 0x208   : > { %1372 = vst.msk [vmem:[#allocation2 + $0x48] sm:$0xff] %vm1362_vm7, %v1285_v60  ;;  %1328 = vrot.lane.b32.xlu1 %v2440_v21, %s2797_s5 }
 0x209   : > { %1296 = vrot.lane.b32.xlu0 %v2424_v26, %s2797_s5  ;;  %s2224_s5 = sshll.u32 %s3881_s3, 4  ;;  %s3954_s5 = int_to_ptr.vmem [resolvable:$true] %s2224_s5 }
 0x20a   : > { %v1508_v58 = vpop.permute.xlu1 %1507  ;;  %s2714_s15 = scalar_lea.vmem %s3954_s5, 4096 }
 0x20b   : > { %v1476_v23 = vpop.permute.xlu0 %1475  ;;  %1580 = vst.msk [vmem:[#allocation2 + $0xc0] sm:$0xff] %vm1555_vm8, %v1508_v58  ;;  %p2715_p12 = scmp.ne.s32.totalorder %s3954_s5, %s2714_s15 }
 0x20c   : > { %1564 = vst.msk [vmem:[#allocation2 + $0x40] sm:$0xff] %vm1555_vm8, %v1476_v23  ;;  %1519 = vrot.lane.b32.xlu1 %v2471_v1, %s2798_s6 }
 0x20d   : > { %1487 = vrot.lane.b32.xlu0 %v2455_v18, %s2798_s6  ;;  %p2716_p13 = pnand %p2715_p12, %p2857_p4 }
 0x20e   : > { %v1478_v22 = vpop.permute.xlu1 %1477 }
 0x20f   : > { %v932_v40 = vpop.permute.xlu0 %931  ;;  %1565 = vst.msk [vmem:[#allocation2 + $0x48] sm:$0xff] %vm1555_vm8, %v1478_v22  ;;  %p2717_p0 = pneg %p2716_p13 }
 0x210   : > { %1002 = vst.msk [vmem:[#allocation2 + $0xd0] sm:$0xff] %vm975_vm5, %v932_v40  ;;  %1521 = vrot.lane.b32.xlu1 %v2472_v41, %s2798_s6 }
 0x211   : > { %1489 = vrot.lane.b32.xlu0 %v2456_v50, %s2798_s6 }
 0x212   : > { %v1669_v30 = vpop.permute.xlu1 %1668 }
 0x213   : > { %v1510_v56 = vpop.permute.xlu0 %1509  ;;  %1757 = vst.msk [vmem:[#allocation2 + $0x40] sm:$0xff] %vm1748_vm9, %v1669_v30 }
 0x214   : > { %1581 = vst.msk [vmem:[#allocation2 + $0xc8] sm:$0xff] %vm1555_vm8, %v1510_v56  ;;  %1712 = vrot.lane.b32.xlu1 %v2503_v7, %s2799_s18 }
 0x215   : > { %1680 = vrot.lane.b32.xlu0 %v2487_v51, %s2799_s18 }
 0x216   : > { %v934_v28 = vpop.permute.xlu1 %933 }
 0x217   : > { %v1701_v31 = vpop.permute.xlu0 %1700  ;;  %1003 = vst.msk [vmem:[#allocation2 + $0xd8] sm:$0xff] %vm975_vm5, %v934_v28 }
 0x218   : > { %1773 = vst.msk [vmem:[#allocation2 + $0xc0] sm:$0xff] %vm1748_vm9, %v1701_v31  ;;  %1714 = vrot.lane.b32.xlu1 %v2504_v6, %s2799_s18 }
 0x219   : > { %1682 = vrot.lane.b32.xlu0 %v2488_v57, %s2799_s18  ;;  %s2718_s18 = sshll.u32 %s2800_s16, 4  ;;  %s2719_s18 = int_to_ptr.vmem [resolvable:$false] %s2718_s18 }
 0x21a   : > { %v1125_v0 = vpop.permute.xlu1 %1124  ;;  %v1789_v32 = vld [vmem:[#allocation2 + $0x40] sm:$0xff]  ;;  %s2720_s20 = scalar_lea.vmem %s2719_s18, 8192  ;;  %p2721_p1 = scmp.lt.s32.totalorder %s3954_s5, %s2719_s18 }
 0x21b   : > { %v1093_v2 = vpop.permute.xlu0 %1092  ;;  %1195 = vst.msk [vmem:[#allocation2 + $0xd0] sm:$0xff] %vm1168_vm6, %v1125_v0  ;;  %2603 = vmatprep.mubr.msk.f32.mxu0 %vm1818_vm10, %v1789_v32  ;;  %p2722_p2 = scmp.lt.s32.totalorder %s2720_s20, %s2714_s15 }
 0x21c   : > { %1179 = vst.msk [vmem:[#allocation2 + $0x50] sm:$0xff] %vm1168_vm6, %v1093_v2 }
 0x21d   : > { %p2723_p3 = por %p2722_p2, %p2721_p1 }
 0x21e   : > { %v1703_v33 = vpop.permute.xlu1 %1702 }
 0x21f   : > { %v1671_v34 = vpop.permute.xlu0 %1670  ;;  %v1805_v35 = vld [vmem:[#allocation2 + $0xc0] sm:$0xff]  ;;  %1774 = vst.msk [vmem:[#allocation2 + $0xc8] sm:$0xff] %vm1748_vm9, %v1703_v33  ;;  %p2724_p5 = pnand %p2723_p3, %p2717_p0 }
 0x220   : > { %1758 = vst.msk [vmem:[#allocation2 + $0x48] sm:$0xff] %vm1748_vm9, %v1671_v34  ;;  %2627 = vmatprep.mubr.msk.f32.mxu1 %vm1818_vm10, %v1805_v35 }
 0x222   : > { %v1127_v8 = vpop.permute.xlu1 %1126 }
 0x223   : > { %v1095_v9 = vpop.permute.xlu0 %1094  ;;  %1196 = vst.msk [vmem:[#allocation2 + $0xd8] sm:$0xff] %vm1168_vm6, %v1127_v8 }
 0x224   : > { %1180 = vst.msk [vmem:[#allocation2 + $0x58] sm:$0xff] %vm1168_vm6, %v1095_v9 }
 0x226   : > { %v1319_v53 = vpop.permute.xlu1 %1318  ;;  %v1806_v11 = vld [vmem:[#allocation2 + $0xc8] sm:$0xff] }
 0x227   : > { %v1287_v10 = vpop.permute.xlu0 %1286  ;;  %v1790_v52 = vld [vmem:[#allocation2 + $0x48] sm:$0xff]  ;;  %1389 = vst.msk [vmem:[#allocation2 + $0xd0] sm:$0xff] %vm1362_vm7, %v1319_v53  ;;  %2628 = vmatmul.mubr.msk.f32.gmra.mxu1 %vm1818_vm10, %v1806_v11 }
 0x228   : > { %1373 = vst.msk [vmem:[#allocation2 + $0x50] sm:$0xff] %vm1362_vm7, %v1287_v10  ;;  %2604 = vmatmul.mubr.msk.f32.gmra.mxu0 %vm1818_vm10, %v1790_v52 }
 0x22a   : > { %v1321_v45 = vpop.permute.xlu1 %1320 }
 0x22b   : > { %v1289_v14 = vpop.permute.xlu0 %1288  ;;  %1390 = vst.msk [vmem:[#allocation2 + $0xd8] sm:$0xff] %vm1362_vm7, %v1321_v45 }
 0x22c   : > { %1374 = vst.msk [vmem:[#allocation2 + $0x58] sm:$0xff] %vm1362_vm7, %v1289_v14 }
 0x22e   : > { %v1512_v25 = vpop.permute.xlu1 %1511 }
 0x22f   : > { %v1480_v15 = vpop.permute.xlu0 %1479  ;;  %1582 = vst.msk [vmem:[#allocation2 + $0xd0] sm:$0xff] %vm1555_vm8, %v1512_v25 }
 0x230   : > { %1566 = vst.msk [vmem:[#allocation2 + $0x50] sm:$0xff] %vm1555_vm8, %v1480_v15 }
 0x232   : > { %v936_v44 = vpop.permute.xlu1 %935 }
 0x233   : > { %v904_v42 = vpop.permute.xlu0 %903  ;;  %1004 = vst.msk [vmem:[#allocation2 + $0xe0] sm:$0xff] %vm975_vm5, %v936_v44 }
 0x234   : > { %988 = vst.msk [vmem:[#allocation2 + $0x60] sm:$0xff] %vm975_vm5, %v904_v42 }
 0x236   : > { %v1514_v24 = vpop.permute.xlu1 %1513 }
 0x237   : > { %v1482_v43 = vpop.permute.xlu0 %1481  ;;  %1583 = vst.msk [vmem:[#allocation2 + $0xd8] sm:$0xff] %vm1555_vm8, %v1514_v24 }
 0x238   : > { %1567 = vst.msk [vmem:[#allocation2 + $0x58] sm:$0xff] %vm1555_vm8, %v1482_v43 }
 0x23a   : > { %v1705_v17 = vpop.permute.xlu1 %1704 }
 0x23b   : > { %v1673_v55 = vpop.permute.xlu0 %1672  ;;  %1775 = vst.msk [vmem:[#allocation2 + $0xd0] sm:$0xff] %vm1748_vm9, %v1705_v17 }
 0x23c   : > { %1759 = vst.msk [vmem:[#allocation2 + $0x50] sm:$0xff] %vm1748_vm9, %v1673_v55 }
 0x23e   : > { %v938_v13 = vpop.permute.xlu1 %937 }
 0x23f   : > { %v906_v54 = vpop.permute.xlu0 %905  ;;  %1005 = vst.msk [vmem:[#allocation2 + $0xe8] sm:$0xff] %vm975_vm5, %v938_v13 }
 0x240   : > { %989 = vst.msk [vmem:[#allocation2 + $0x68] sm:$0xff] %vm975_vm5, %v906_v54 }
 0x242   : > { %v1129_v20 = vpop.permute.xlu1 %1128  ;;  %v1807_v5 = vld [vmem:[#allocation2 + $0xd0] sm:$0xff] }
 0x243   : > { %v1097_v39 = vpop.permute.xlu0 %1096  ;;  %v1791_v19 = vld [vmem:[#allocation2 + $0x50] sm:$0xff]  ;;  %1197 = vst.msk [vmem:[#allocation2 + $0xe0] sm:$0xff] %vm1168_vm6, %v1129_v20  ;;  %2630 = vmatprep.mubr.msk.f32.mxu1 %vm1818_vm10, %v1807_v5 }
 0x244   : > { %1181 = vst.msk [vmem:[#allocation2 + $0x60] sm:$0xff] %vm1168_vm6, %v1097_v39  ;;  %2606 = vmatprep.mubr.msk.f32.mxu0 %vm1818_vm10, %v1791_v19 }
 0x246   : > { %v1707_v38 = vpop.permute.xlu1 %1706 }
 0x247   : > { %v1675_v36 = vpop.permute.xlu0 %1674  ;;  %1776 = vst.msk [vmem:[#allocation2 + $0xd8] sm:$0xff] %vm1748_vm9, %v1707_v38 }
 0x248   : > { %1760 = vst.msk [vmem:[#allocation2 + $0x58] sm:$0xff] %vm1748_vm9, %v1675_v36 }
 0x24a   : > { %v1131_v4 = vpop.permute.xlu1 %1130 }
 0x24b   : > { %v1099_v47 = vpop.permute.xlu0 %1098  ;;  %1198 = vst.msk [vmem:[#allocation2 + $0xe8] sm:$0xff] %vm1168_vm6, %v1131_v4 }
 0x24c   : > { %1182 = vst.msk [vmem:[#allocation2 + $0x68] sm:$0xff] %vm1168_vm6, %v1099_v47 }
 0x24e   : > { %v1323_v37 = vpop.permute.xlu1 %1322  ;;  %v1808_v12 = vld [vmem:[#allocation2 + $0xd8] sm:$0xff] }
 0x24f   : > { %v1291_v61 = vpop.permute.xlu0 %1290  ;;  %v1792_v62 = vld [vmem:[#allocation2 + $0x58] sm:$0xff]  ;;  %1391 = vst.msk [vmem:[#allocation2 + $0xe0] sm:$0xff] %vm1362_vm7, %v1323_v37  ;;  %2631 = vmatmul.mubr.msk.f32.gmra.mxu1 %vm1818_vm10, %v1808_v12 }
 0x250   : > { %1375 = vst.msk [vmem:[#allocation2 + $0x60] sm:$0xff] %vm1362_vm7, %v1291_v61  ;;  %2607 = vmatmul.mubr.msk.f32.gmra.mxu0 %vm1818_vm10, %v1792_v62 }
 0x252   : > { %v1325_v16 = vpop.permute.xlu1 %1324 }
 0x253   : > { %v1293_v46 = vpop.permute.xlu0 %1292  ;;  %1392 = vst.msk [vmem:[#allocation2 + $0xe8] sm:$0xff] %vm1362_vm7, %v1325_v16 }
 0x254   : > { %1376 = vst.msk [vmem:[#allocation2 + $0x68] sm:$0xff] %vm1362_vm7, %v1293_v46 }
 0x256   : > { %v1516_v63 = vpop.permute.xlu1 %1515 }
 0x257   : > { %v1484_v49 = vpop.permute.xlu0 %1483  ;;  %1584 = vst.msk [vmem:[#allocation2 + $0xe0] sm:$0xff] %vm1555_vm8, %v1516_v63  ;;  %v2593_v3 = vpop.f32.mrf.mxu0 }
 0x258   : > { %1568 = vst.msk [vmem:[#allocation2 + $0x60] sm:$0xff] %vm1555_vm8, %v1484_v49  ;;  %v2617_v27 = vpop.f32.mrf.mxu1  ;;  %v2145_v29 = vmax.f32 %v2593_v3, 0.0 }
 0x259   : > { %v2161_v48 = vmax.f32 %v2617_v27, 0.0  ;;  %v1985_v21 = vpop.f32.mrf.mxu0 }
 0x25a   : > { %v2065_v26 = vpop.f32.mrf.mxu1  ;;  %2177 = vst [vmem:[%s3881_s3 + $0x8] sm:$0xff] %v2145_v29  ;;  %v2144_v59 = vmax.f32 %v1985_v21, 0.0  ;;  %v940_v1 = vpop.permute.xlu1 %939 }
 0x25b   : > { %2193 = vst [vmem:[%s3881_s3 + $0x88] sm:$0xff] %v2161_v48  ;;  %v2160_v60 = vmax.f32 %v2065_v26, 0.0  ;;  %v908_v18 = vpop.permute.xlu0 %907  ;;  %1006 = vst.msk [vmem:[#allocation2 + $0xf0] sm:$0xff] %vm975_vm5, %v940_v1 }
 0x25c   : > { %990 = vst.msk [vmem:[#allocation2 + $0x70] sm:$0xff] %vm975_vm5, %v908_v18  ;;  %2176 = vst [vmem:[%s3881_s3] sm:$0xff] %v2144_v59 }
 0x25d   : > { %2192 = vst [vmem:[%s3881_s3 + $0x80] sm:$0xff] %v2160_v60 }
 0x25e   : > { %v1518_v58 = vpop.permute.xlu1 %1517 }
 0x25f   : > { %v1486_v23 = vpop.permute.xlu0 %1485  ;;  %1585 = vst.msk [vmem:[#allocation2 + $0xe8] sm:$0xff] %vm1555_vm8, %v1518_v58 }
 0x260   : > { %1569 = vst.msk [vmem:[#allocation2 + $0x68] sm:$0xff] %vm1555_vm8, %v1486_v23 }
 0x262   : > { %v1709_v41 = vpop.permute.xlu1 %1708 }
 0x263   : > { %v1677_v50 = vpop.permute.xlu0 %1676  ;;  %1777 = vst.msk [vmem:[#allocation2 + $0xe0] sm:$0xff] %vm1748_vm9, %v1709_v41 }
 0x264   : > { %1761 = vst.msk [vmem:[#allocation2 + $0x60] sm:$0xff] %vm1748_vm9, %v1677_v50 }
 0x266   : > { %v942_v22 = vpop.permute.xlu1 %941 }
 0x267   : > { %v910_v40 = vpop.permute.xlu0 %909  ;;  %1007 = vst.msk [vmem:[#allocation2 + $0xf8] sm:$0xff] %vm975_vm5, %v942_v22 }
 0x268   : > { %991 = vst.msk [vmem:[#allocation2 + $0x78] sm:$0xff] %vm975_vm5, %v910_v40 }
 0x26a   : > { %v1133_v7 = vpop.permute.xlu1 %1132  ;;  %v1809_v56 = vld [vmem:[#allocation2 + $0xe0] sm:$0xff] }
 0x26b   : > { %v1101_v51 = vpop.permute.xlu0 %1100  ;;  %v1793_v30 = vld [vmem:[#allocation2 + $0x60] sm:$0xff]  ;;  %1199 = vst.msk [vmem:[#allocation2 + $0xf0] sm:$0xff] %vm1168_vm6, %v1133_v7  ;;  %2633 = vmatprep.mubr.msk.f32.mxu1 %vm1818_vm10, %v1809_v56 }
 0x26c   : > { %1183 = vst.msk [vmem:[#allocation2 + $0x70] sm:$0xff] %vm1168_vm6, %v1101_v51  ;;  %2609 = vmatprep.mubr.msk.f32.mxu0 %vm1818_vm10, %v1793_v30 }
 0x26e   : > { %v1711_v6 = vpop.permute.xlu1 %1710 }
 0x26f   : > { %v1679_v57 = vpop.permute.xlu0 %1678  ;;  %1778 = vst.msk [vmem:[#allocation2 + $0xe8] sm:$0xff] %vm1748_vm9, %v1711_v6 }
 0x270   : > { %1762 = vst.msk [vmem:[#allocation2 + $0x68] sm:$0xff] %vm1748_vm9, %v1679_v57 }
 0x272   : > { %v1135_v28 = vpop.permute.xlu1 %1134 }
 0x273   : > { %v1103_v31 = vpop.permute.xlu0 %1102  ;;  %1200 = vst.msk [vmem:[#allocation2 + $0xf8] sm:$0xff] %vm1168_vm6, %v1135_v28 }
 0x274   : > { %1184 = vst.msk [vmem:[#allocation2 + $0x78] sm:$0xff] %vm1168_vm6, %v1103_v31 }
 0x276   : > { %v1327_v0 = vpop.permute.xlu1 %1326  ;;  %v1810_v33 = vld [vmem:[#allocation2 + $0xe8] sm:$0xff] }
 0x277   : > { %v1295_v2 = vpop.permute.xlu0 %1294  ;;  %v1794_v32 = vld [vmem:[#allocation2 + $0x68] sm:$0xff]  ;;  %1393 = vst.msk [vmem:[#allocation2 + $0xf0] sm:$0xff] %vm1362_vm7, %v1327_v0  ;;  %2634 = vmatmul.mubr.msk.f32.gmra.mxu1 %vm1818_vm10, %v1810_v33 }
 0x278   : > { %1377 = vst.msk [vmem:[#allocation2 + $0x70] sm:$0xff] %vm1362_vm7, %v1295_v2  ;;  %2610 = vmatmul.mubr.msk.f32.gmra.mxu0 %vm1818_vm10, %v1794_v32 }
 0x27a   : > { %v1329_v34 = vpop.permute.xlu1 %1328 }
 0x27b   : > { %v1297_v35 = vpop.permute.xlu0 %1296  ;;  %1394 = vst.msk [vmem:[#allocation2 + $0xf8] sm:$0xff] %vm1362_vm7, %v1329_v34  ;;  %v2596_v8 = vpop.f32.mrf.mxu0 }
 0x27c   : > { %1378 = vst.msk [vmem:[#allocation2 + $0x78] sm:$0xff] %vm1362_vm7, %v1297_v35  ;;  %v2620_v9 = vpop.f32.mrf.mxu1  ;;  %v2147_v53 = vmax.f32 %v2596_v8, 0.0 }
 0x27d   : > { %v2163_v10 = vmax.f32 %v2620_v9, 0.0  ;;  %v1995_v52 = vpop.f32.mrf.mxu0 }
 0x27e   : > { %v2075_v11 = vpop.f32.mrf.mxu1  ;;  %2179 = vst [vmem:[%s3881_s3 + $0x18] sm:$0xff] %v2147_v53  ;;  %v2146_v45 = vmax.f32 %v1995_v52, 0.0  ;;  %v1520_v25 = vpop.permute.xlu1 %1519 }
 0x27f   : > { %2195 = vst [vmem:[%s3881_s3 + $0x98] sm:$0xff] %v2163_v10  ;;  %v2162_v14 = vmax.f32 %v2075_v11, 0.0  ;;  %v1488_v15 = vpop.permute.xlu0 %1487  ;;  %1586 = vst.msk [vmem:[#allocation2 + $0xf0] sm:$0xff] %vm1555_vm8, %v1520_v25 }
 0x280   : > { %1570 = vst.msk [vmem:[#allocation2 + $0x70] sm:$0xff] %vm1555_vm8, %v1488_v15  ;;  %2178 = vst [vmem:[%s3881_s3 + $0x10] sm:$0xff] %v2146_v45 }
 0x281   : > { %2194 = vst [vmem:[%s3881_s3 + $0x90] sm:$0xff] %v2162_v14 }
 0x282   : > { %v1522_v44 = vpop.permute.xlu1 %1521 }
 0x283   : > { %v1490_v42 = vpop.permute.xlu0 %1489  ;;  %1587 = vst.msk [vmem:[#allocation2 + $0xf8] sm:$0xff] %vm1555_vm8, %v1522_v44 }
 0x284   : > { %1571 = vst.msk [vmem:[#allocation2 + $0x78] sm:$0xff] %vm1555_vm8, %v1490_v42 }
 0x286   : > { %v1713_v24 = vpop.permute.xlu1 %1712 }
 0x287   : > { %v1681_v43 = vpop.permute.xlu0 %1680  ;;  %1779 = vst.msk [vmem:[#allocation2 + $0xf0] sm:$0xff] %vm1748_vm9, %v1713_v24 }
 0x288   : > { %1763 = vst.msk [vmem:[#allocation2 + $0x70] sm:$0xff] %vm1748_vm9, %v1681_v43 }
 0x28a   : > { %v1715_v17 = vpop.permute.xlu1 %1714 }
 0x28b   : > { %v1683_v55 = vpop.permute.xlu0 %1682  ;;  %1780 = vst.msk [vmem:[#allocation2 + $0xf8] sm:$0xff] %vm1748_vm9, %v1715_v17 }
 0x28c   : > { %1764 = vst.msk [vmem:[#allocation2 + $0x78] sm:$0xff] %vm1748_vm9, %v1683_v55 }
 0x28e   : > { %v1811_v54 = vld [vmem:[#allocation2 + $0xf0] sm:$0xff] }
 0x28f   : > { %v1795_v13 = vld [vmem:[#allocation2 + $0x70] sm:$0xff]  ;;  %2636 = vmatprep.mubr.msk.f32.mxu1 %vm1818_vm10, %v1811_v54 }
 0x290   : > { %2612 = vmatprep.mubr.msk.f32.mxu0 %vm1818_vm10, %v1795_v13 }
 0x292   : > { %v1812_v39 = vld [vmem:[#allocation2 + $0xf8] sm:$0xff] }
 0x293   : > { %v1796_v20 = vld [vmem:[#allocation2 + $0x78] sm:$0xff]  ;;  %2637 = vmatmul.mubr.msk.f32.gmra.mxu1 %vm1818_vm10, %v1812_v39 }
 0x294   : > { %2613 = vmatmul.mubr.msk.f32.gmra.mxu0 %vm1818_vm10, %v1796_v20 }
 0x29f   : > { %v2599_v19 = vpop.f32.mrf.mxu0 }
 0x2a0   : > { %v2623_v5 = vpop.f32.mrf.mxu1  ;;  %v2149_v38 = vmax.f32 %v2599_v19, 0.0 }
 0x2a1   : > { %v2165_v36 = vmax.f32 %v2623_v5, 0.0  ;;  %v2005_v4 = vpop.f32.mrf.mxu0 }
 0x2a2   : > { %v2085_v47 = vpop.f32.mrf.mxu1  ;;  %2181 = vst [vmem:[%s3881_s3 + $0x28] sm:$0xff] %v2149_v38  ;;  %v2148_v37 = vmax.f32 %v2005_v4, 0.0 }
 0x2a3   : > { %2197 = vst [vmem:[%s3881_s3 + $0xa8] sm:$0xff] %v2165_v36  ;;  %v2164_v61 = vmax.f32 %v2085_v47, 0.0 }
 0x2a4   : > { %2180 = vst [vmem:[%s3881_s3 + $0x20] sm:$0xff] %v2148_v37 }
 0x2a5   : > { %2196 = vst [vmem:[%s3881_s3 + $0xa0] sm:$0xff] %v2164_v61 }
 0x2c3   : > { %v2602_v62 = vpop.f32.mrf.mxu0 }
 0x2c4   : > { %v2626_v12 = vpop.f32.mrf.mxu1  ;;  %v2151_v16 = vmax.f32 %v2602_v62, 0.0 }
 0x2c5   : > { %v2167_v46 = vmax.f32 %v2626_v12, 0.0  ;;  %v2015_v63 = vpop.f32.mrf.mxu0 }
 0x2c6   : > { %v2095_v49 = vpop.f32.mrf.mxu1  ;;  %2183 = vst [vmem:[%s3881_s3 + $0x38] sm:$0xff] %v2151_v16  ;;  %v2150_v3 = vmax.f32 %v2015_v63, 0.0 }
 0x2c7   : > { %2199 = vst [vmem:[%s3881_s3 + $0xb8] sm:$0xff] %v2167_v46  ;;  %v2166_v27 = vmax.f32 %v2095_v49, 0.0 }
 0x2c8   : > { %2182 = vst [vmem:[%s3881_s3 + $0x30] sm:$0xff] %v2150_v3 }
 0x2c9   : > { %2198 = vst [vmem:[%s3881_s3 + $0xb0] sm:$0xff] %v2166_v27 }
 0x2e7   : > { %v2629_v48 = vpop.f32.mrf.mxu1 }
 0x2e8   : > { %v2605_v29 = vpop.f32.mrf.mxu0  ;;  %v2169_v26 = vmax.f32 %v2629_v48, 0.0 }
 0x2e9   : > { %v2153_v21 = vmax.f32 %v2605_v29, 0.0  ;;  %v2105_v60 = vpop.f32.mrf.mxu1 }
 0x2ea   : > { %v2025_v59 = vpop.f32.mrf.mxu0  ;;  %2201 = vst [vmem:[%s3881_s3 + $0xc8] sm:$0xff] %v2169_v26  ;;  %v2168_v18 = vmax.f32 %v2105_v60, 0.0 }
 0x2eb   : > { %2185 = vst [vmem:[%s3881_s3 + $0x48] sm:$0xff] %v2153_v21  ;;  %v2152_v1 = vmax.f32 %v2025_v59, 0.0 }
 0x2ec   : > { %2200 = vst [vmem:[%s3881_s3 + $0xc0] sm:$0xff] %v2168_v18 }
 0x2ed   : > { %2184 = vst [vmem:[%s3881_s3 + $0x40] sm:$0xff] %v2152_v1 }
 0x30f   : > { %v2632_v23 = vpop.f32.mrf.mxu1 }
 0x310   : > { %v2608_v58 = vpop.f32.mrf.mxu0  ;;  %v2171_v50 = vmax.f32 %v2632_v23, 0.0 }
 0x311   : > { %v2155_v41 = vmax.f32 %v2608_v58, 0.0  ;;  %v2115_v40 = vpop.f32.mrf.mxu1 }
 0x312   : > { %v2035_v22 = vpop.f32.mrf.mxu0  ;;  %2203 = vst [vmem:[%s3881_s3 + $0xd8] sm:$0xff] %v2171_v50  ;;  %v2170_v51 = vmax.f32 %v2115_v40, 0.0 }
 0x313   : > { %2187 = vst [vmem:[%s3881_s3 + $0x58] sm:$0xff] %v2155_v41  ;;  %v2154_v7 = vmax.f32 %v2035_v22, 0.0 }
 0x314   : > { %2202 = vst [vmem:[%s3881_s3 + $0xd0] sm:$0xff] %v2170_v51 }
 0x315   : > { %2186 = vst [vmem:[%s3881_s3 + $0x50] sm:$0xff] %v2154_v7 }
 0x337   : > { %v2635_v56 = vpop.f32.mrf.mxu1 }
 0x338   : > { %v2611_v30 = vpop.f32.mrf.mxu0  ;;  %v2173_v57 = vmax.f32 %v2635_v56, 0.0 }
 0x339   : > { %v2157_v6 = vmax.f32 %v2611_v30, 0.0  ;;  %v2125_v31 = vpop.f32.mrf.mxu1 }
 0x33a   : > { %v2045_v28 = vpop.f32.mrf.mxu0  ;;  %2205 = vst [vmem:[%s3881_s3 + $0xe8] sm:$0xff] %v2173_v57  ;;  %v2172_v2 = vmax.f32 %v2125_v31, 0.0 }
 0x33b   : > { %2189 = vst [vmem:[%s3881_s3 + $0x68] sm:$0xff] %v2157_v6  ;;  %v2156_v0 = vmax.f32 %v2045_v28, 0.0 }
 0x33c   : > { %2204 = vst [vmem:[%s3881_s3 + $0xe0] sm:$0xff] %v2172_v2 }
 0x33d   : > { %2188 = vst [vmem:[%s3881_s3 + $0x60] sm:$0xff] %v2156_v0 }
 0x353   : > { %v2638_v33 = vpop.f32.mrf.mxu1 }
 0x354   : > { %v2614_v32 = vpop.f32.mrf.mxu0  ;;  %v2175_v35 = vmax.f32 %v2638_v33, 0.0 }
 0x355   : > { %v2159_v34 = vmax.f32 %v2614_v32, 0.0  ;;  %v2135_v9 = vpop.f32.mrf.mxu1 }
 0x356   : > { %v2055_v8 = vpop.f32.mrf.mxu0  ;;  %2207 = vst [vmem:[%s3881_s3 + $0xf8] sm:$0xff] %v2175_v35  ;;  %v2174_v10 = vmax.f32 %v2135_v9, 0.0 }
 0x357   : > { %2191 = vst [vmem:[%s3881_s3 + $0x78] sm:$0xff] %v2159_v34  ;;  %v2158_v53 = vmax.f32 %v2055_v8, 0.0 }
 0x358   : > { %2206 = vst [vmem:[%s3881_s3 + $0xf0] sm:$0xff] %v2174_v10 }
 0x359   : > { %2190 = vst [vmem:[%s3881_s3 + $0x70] sm:$0xff] %v2158_v53 }
 0x35a   : > { %2727 = shalt.err (!%p2724_p5)
}
 0x35b   : > { %s2728_s23 = scalar_lea.hbm %s3950_s8, 4096  ;;  %s2732_s26 = scalar_lea.hbm %s4008_s2, 8192 }
 0x35c   : > { %p2729_p6 = scmp.ne.s32.totalorder %s3950_s8, %s2728_s23  ;;  %p2733_p10 = scmp.lt.s32.totalorder %s3950_s8, %s4008_s2 }
 0x35d   : > { %p2734_p11 = scmp.lt.s32.totalorder %s2732_s26, %s2728_s23 }
 0x35e   : > { %p2730_p7 = pnand %p2729_p6, %p2857_p4 }
 0x35f   : > { %p2735_p12 = por %p2734_p11, %p2733_p10 }
 0x360   : > { %p2731_p9 = pneg %p2730_p7 }
 0x362   : > { %p2736_p13 = pnand %p2735_p12, %p2731_p9 }
 0x364   : > { %2739 = shalt.err (!%p2736_p13)
}
 0x365   : > { %s2801_s30 = smov 128  }
 0x366   : > { %2650 = dma.vmem_to_hbm [thread:$0]  (%p2857_p4), %s3954_s5, 4096, %s3950_s8, %s3960_s12, %s2801_s30, %s2801_s30, %s2793_s29  }
 0x367 PF: > { %p2656_p0 = scmp.ge.s32.totalorder %s2790_s14, 2  ;;  %s2239_s3 = sand.u32 1, %s2770_s9  }
 0x368   : > { %s2240_s4 = scalar_lea.sflag [#allocation4], %s2239_s3 }
 0x369   : > { %p2653_p1 = pnand %p2656_p0, %p2864_p8 }
 0x36b   : > { %p2654_p2 = pneg %p2653_p1 }
 0x36d   : > { %2765 = dma.done.wait (%p2654_p2), %s2240_s4, 4096  }
 0x36e   : > { %2767 = vsyncadd (%p2654_p2), %s2240_s4, 4294963200  ;;  %s15_s14 = sadd.s32 1, %s2790_s14   ;;  %s4042_s9 = smov %s2774_s10 }
 0x36f   : > { %p12_p3 = scmp.ge.s32.totalorder %s15_s14, 4   ;;  %s4043_s10 = smov %s2778_s11 }
 0x370   : > { %s4044_s11 = smov %s2870_s22  ;;  %s4045_s12 = smov %s2786_s13 }
 0x371   : > { %s4046_s13 = smov %s4048_s17  ;;  %14 = sbr.rel (!%p12_p3) target bundleno = 4 (0x4), region = 65 }
 0x376   :  { %2245 = vsyncpa [#allocation4], 1 }
 0x377   :  { %2247 = vsyncpa [#allocation4 + $0x1], 1 }

</bundles_post_ra>
